<compile_context>
chip_gen: v6e
topology: v6e:2x2x1
jax: 0.10.0
libtpu: 0.0.40
codegen_flags: <defaults>
</compile_context>

<pallas_src>
import functools

import jax
import jax.numpy as jnp
from jax import lax
from jax.experimental import pallas as pl
from jax.experimental.pallas import tpu as pltpu


def _round_up(x, m):
    return (x + m - 1) // m * m


def _sigmoid_via_tanh(x):
    # sigmoid(x) == 0.5 * (tanh(x/2) + 1): single EUP push per element.
    return 0.5 * (jnp.tanh(0.5 * x) + 1.0)


def _pick_vmem_limit(needed_bytes):
    """Scoped-VMEM limit from actual buffer needs, capped near physical VMEM."""
    try:
        phys = pltpu.get_tpu_info().vmem_capacity_bytes
    except Exception:
        phys = 64 * 1024 * 1024          # conservative: v7x per-core VMEM
    cap = int(phys * 0.85)
    want = max(int(needed_bytes * 5 // 4), 32 * 1024 * 1024)
    return max(min(want, cap), 16 * 1024 * 1024)


def _lstm_chunk_kernel(z0_ref, x_ref, w_ref, u_ref, b_ref,
                       h_out_ref, c_out_ref, z_scr, gx_scr,
                       *, hidden_pad, t_chunk):
    t = pl.program_id(1)                 # time-chunk index (sequential axis)
    Hp = hidden_pad
    Tc = t_chunk
    Bt = x_ref.shape[1]
    Ip = x_ref.shape[2]

    # Carried recurrent state lives in f32 VMEM scratch across all time chunks
    # of this batch tile; re-initialized whenever a new batch tile starts.
    @pl.when(t == 0)
    def _():
        z_scr[...] = z0_ref[...]

    # ---- time-parallel input projection (off the recurrence critical path) --
    # One MXU matmul with M = Tc*Bt instead of Tc tiny M=Bt matmuls.
    x_flat = x_ref[...].reshape(Tc * Bt, Ip)                       # bf16
    gx_scr[...] = jnp.dot(
        x_flat, w_ref[...], preferred_element_type=jnp.float32
    ).reshape(Tc, Bt, 4 * Hp)

    bias = b_ref[...]                                              # (Bt, 4Hp) f32

    # ---- serial recurrence: only z @ U + gates + state update ---------------
    def step(s, z):
        gates = (
            gx_scr[s]
            + jnp.dot(z.astype(jnp.bfloat16), u_ref[...],
                      preferred_element_type=jnp.float32)
            + bias
        )                                                          # (Bt, 4Hp) f32
        # Hp % 128 == 0, so every gate slice is lane-aligned.  Reference uses
        # z as both h_prev and c_prev.  Keep gate live ranges narrow.
        c = (_sigmoid_via_tanh(gates[:, 1 * Hp:2 * Hp]) * z            # f * z
             + _sigmoid_via_tanh(gates[:, 0 * Hp:1 * Hp])              # i
             * jnp.tanh(gates[:, 2 * Hp:3 * Hp]))                      # g
        h = _sigmoid_via_tanh(gates[:, 3 * Hp:4 * Hp]) * jnp.tanh(c)   # o*tanh(c)
        h_out_ref[s] = h.astype(h_out_ref.dtype)
        c_out_ref[s] = c.astype(c_out_ref.dtype)
        return h                                                   # z_{s+1}

    z_scr[...] = lax.fori_loop(0, Tc, step, z_scr[...], unroll=(Tc <= 16))


def lstm_sequence_forward(z0, xs, W, U, b, *, time_chunk=8):
    """Run T chained LSTMCell.forward steps in one Pallas call.

    z0: (B, H)     initial state (used as both h_prev and c_prev, as in the
                   reference forward)
    xs: (T, B, I)  inputs for T steps
    W:  (I, 4H), U: (H, 4H), b: (1, 4H)   gate order [i, f, g(c), o]
    Returns (hs, cs), each (T, B, H) in bf16: the (z_next, c_next) pairs of
    each step, with z chained (z_{t+1} = h_t) in f32 inside the kernel.
    """
    T, B, I = xs.shape
    H = z0.shape[1]
    assert W.shape == (I, 4 * H)
    assert U.shape == (H, 4 * H)
    assert b.shape == (1, 4 * H)

    # --- pad to TPU-friendly shapes ------------------------------------------
    Bp = max(16, _round_up(B, 16))       # bf16 packs two rows per sublane
    Ip = _round_up(I, 128)
    Hp = _round_up(H, 128)
    Tc = max(1, min(time_chunk, T))      # timesteps per grid invocation
    Tp = _round_up(T, Tc)
    nt = Tp // Tc

    # Batch tiling: split across TensorCores (v7x megacore) when batch allows.
    Bt = Bp // 2 if (Bp >= 32 and Bp % 32 == 0) else Bp
    nb = Bp // Bt

    xs_p = jnp.zeros((Tp, Bp, Ip), jnp.bfloat16)
    xs_p = xs_p.at[:T, :B, :I].set(xs.astype(jnp.bfloat16))
    z0_p = jnp.zeros((Bp, Hp), jnp.float32)
    z0_p = z0_p.at[:B, :H].set(z0.astype(jnp.float32))

    # Re-pack each gate into its own lane-aligned Hp-wide slab.
    W_p = jnp.zeros((Ip, 4 * Hp), jnp.bfloat16)
    U_p = jnp.zeros((Hp, 4 * Hp), jnp.bfloat16)
    b_p = jnp.zeros((1, 4 * Hp), jnp.float32)
    for gi in range(4):
        W_p = W_p.at[:I, gi * Hp:gi * Hp + H].set(
            W[:, gi * H:(gi + 1) * H].astype(jnp.bfloat16))
        U_p = U_p.at[:H, gi * Hp:gi * Hp + H].set(
            U[:, gi * H:(gi + 1) * H].astype(jnp.bfloat16))
        b_p = b_p.at[:, gi * Hp:gi * Hp + H].set(
            b[:, gi * H:(gi + 1) * H].astype(jnp.float32))
    # Pre-broadcast bias over the batch tile: plain vreg add in the kernel,
    # no per-step sublane broadcast.
    b_p = jnp.broadcast_to(b_p, (Bt, 4 * Hp))

    kernel = functools.partial(_lstm_chunk_kernel, hidden_pad=Hp, t_chunk=Tc)

    flops = 2 * Tp * Bp * (Ip + Hp) * 4 * Hp + 12 * Tp * Bp * Hp
    transcendentals = 5 * Tp * Bp * Hp
    bytes_accessed = (xs_p.size * 2 + z0_p.size * 4 + W_p.size * 2
                      + U_p.size * 2 + b_p.size * 4 + 2 * Tp * Bp * Hp * 2)

    def run(single_buffer_weights):
        resident = ({"pipeline_mode": pl.Buffered(1)}
                    if single_buffer_weights else {})
        wbuf = 1 if single_buffer_weights else 2
        vmem_need = (
            wbuf * (W_p.size * 2 + U_p.size * 2 + b_p.size * 4 + Bt * Hp * 4)
            + 2 * (Tc * Bt * Ip * 2)                  # x chunk, double-buffered
            + 2 * 2 * (Tc * Bt * Hp * 2)              # h/c outs, double-buffered
            + Bt * Hp * 4 + Tc * Bt * 4 * Hp * 4      # scratch (z, Gx)
        )
        return pl.pallas_call(
            kernel,
            out_shape=(
                jax.ShapeDtypeStruct((Tp, Bp, Hp), jnp.bfloat16),
                jax.ShapeDtypeStruct((Tp, Bp, Hp), jnp.bfloat16),
            ),
            grid=(nb, nt),
            in_specs=[
                pl.BlockSpec((Bt, Hp), lambda bi, ti: (bi, 0), **resident),      # z0
                pl.BlockSpec((Tc, Bt, Ip), lambda bi, ti: (ti, bi, 0)),          # x chunk
                pl.BlockSpec((Ip, 4 * Hp), lambda bi, ti: (0, 0), **resident),   # W
                pl.BlockSpec((Hp, 4 * Hp), lambda bi, ti: (0, 0), **resident),   # U
                pl.BlockSpec((Bt, 4 * Hp), lambda bi, ti: (0, 0), **resident),   # bias
            ],
            out_specs=(
                pl.BlockSpec((Tc, Bt, Hp), lambda bi, ti: (ti, bi, 0)),
                pl.BlockSpec((Tc, Bt, Hp), lambda bi, ti: (ti, bi, 0)),
            ),
            scratch_shapes=[
                pltpu.VMEM((Bt, Hp), jnp.float32),           # carried z state
                pltpu.VMEM((Tc, Bt, 4 * Hp), jnp.float32),   # Gx = x @ W chunk
            ],
            compiler_params=pltpu.CompilerParams(
                # batch tiles independent -> parallel (uses both v7x TCs);
                # time is a true recurrence -> sequential, innermost.
                dimension_semantics=("parallel", "arbitrary"),
                vmem_limit_bytes=_pick_vmem_limit(vmem_need),
            ),
            cost_estimate=pl.CostEstimate(
                flops=flops,
                transcendentals=transcendentals,
                bytes_accessed=bytes_accessed,
            ),
        )(z0_p, xs_p, W_p, U_p, b_p)

    try:
        hs_p, cs_p = run(single_buffer_weights=True)
    except Exception:
        # Fallback for jax builds without BlockSpec(pipeline_mode=pl.Buffered(1)).
        hs_p, cs_p = run(single_buffer_weights=False)

    return hs_p[:T, :B, :H], cs_p[:T, :B, :H]


def lstm_cell_forward(z, x, W, U, b):
    """Single LSTMCell.forward step (== T=1 case of the fused kernel)."""
    hs, cs = lstm_sequence_forward(z, x[None], W, U, b)
    return hs[0], cs[0]


def _reference_cell(z, x, W, U, b):
    H = z.shape[1]
    gates = x @ W + z @ U + b
    i = jax.nn.sigmoid(gates[:, 0 * H:1 * H])
    f = jax.nn.sigmoid(gates[:, 1 * H:2 * H])
    g = jnp.tanh(gates[:, 2 * H:3 * H])
    o = jax.nn.sigmoid(gates[:, 3 * H:4 * H])
    c_next = f * z + i * g
    h_next = o * jnp.tanh(c_next)
    return h_next, c_next


if __name__ == "__main__":
    key = jax.random.PRNGKey(0)

    batch = 4
    input_size = 16
    hidden_size = 32
    seq_len = 6

    kx, kz, kw, ku, kb = jax.random.split(key, 5)

    xs = jax.random.normal(kx, (seq_len, batch, input_size), dtype=jnp.float32)
    z0 = jax.random.normal(kz, (batch, hidden_size), dtype=jnp.float32)

    # Stacked gate weights [i, f, g(c), o], pre-transposed to (in, out);
    # mimics nn.Linear uniform(-1/sqrt(fan_in), +1/sqrt(fan_in)) init.
    bound_w = 1.0 / jnp.sqrt(input_size)
    bound_u = 1.0 / jnp.sqrt(hidden_size)
    W = jax.random.uniform(kw, (input_size, 4 * hidden_size),
                           minval=-bound_w, maxval=bound_w, dtype=jnp.float32)
    U = jax.random.uniform(ku, (hidden_size, 4 * hidden_size),
                           minval=-bound_u, maxval=bound_u, dtype=jnp.float32)
    b = jax.random.uniform(kb, (1, 4 * hidden_size),
                           minval=-bound_w, maxval=bound_w, dtype=jnp.float32)

    # --- single-step (exactly the module's forward) --------------------------
    h1, c1 = lstm_cell_forward(z0, xs[0], W, U, b)
    h1, c1 = jax.block_until_ready((h1, c1))
    h1_ref, c1_ref = _reference_cell(z0, xs[0], W, U, b)
    assert jnp.allclose(h1.astype(jnp.float32), h1_ref, atol=2e-2, rtol=2e-2)
    assert jnp.allclose(c1.astype(jnp.float32), c1_ref, atol=2e-2, rtol=2e-2)

    # --- fused T-step sequence (weights VMEM-resident, time-parallel x@W) ----
    hs, cs = lstm_sequence_forward(z0, xs, W, U, b)
    hs, cs = jax.block_until_ready((hs, cs))

    z_ref = z0
    for t in range(seq_len):
        h_ref, c_ref = _reference_cell(z_ref, xs[t], W, U, b)
        assert jnp.allclose(hs[t].astype(jnp.float32), h_ref, atol=2e-2, rtol=2e-2)
        assert jnp.allclose(cs[t].astype(jnp.float32), c_ref, atol=2e-2, rtol=2e-2)
        z_ref = h_ref   # module returns (z_next, c_next) = (h_next, c_next)

    print("KERNEL_OK")
</pallas_src>

<mosaic_0001>
module attributes {stable_mosaic.version = 11 : i64} {
  func.func @_lstm_chunk_kernel(%arg0: i32, %arg1: i32, %arg2: memref<16x128xf32, #tpu.memory_space<vmem>>, %arg3: memref<1x16x128xbf16, #tpu.memory_space<vmem>>, %arg4: memref<128x512xbf16, #tpu.memory_space<vmem>>, %arg5: memref<128x512xbf16, #tpu.memory_space<vmem>>, %arg6: memref<16x512xf32, #tpu.memory_space<vmem>>, %arg7: memref<1x16x128xbf16, #tpu.memory_space<vmem>>, %arg8: memref<1x16x128xbf16, #tpu.memory_space<vmem>>, %arg9: memref<16x128xf32, #tpu.memory_space<vmem>>, %arg10: memref<1x16x512xf32, #tpu.memory_space<vmem>>) attributes {dimension_semantics = [#tpu.dimension_semantics<parallel>, #tpu.dimension_semantics<arbitrary>], iteration_bounds = array<i64: 1, 1>, scalar_prefetch = 0 : i64, scratch_operands = 2 : i64, tpu.core_type = #tpu.core_type<tc>, window_params = [{pipeline_mode = #tpu.pipeline_mode<synchronous>, transform_indices = @transform_0, window_bounds = array<i64: 16, 128>}, {transform_indices = @transform_1, window_bounds = array<i64: 1, 16, 128>}, {pipeline_mode = #tpu.pipeline_mode<synchronous>, transform_indices = @transform_2, window_bounds = array<i64: 128, 512>}, {pipeline_mode = #tpu.pipeline_mode<synchronous>, transform_indices = @transform_3, window_bounds = array<i64: 128, 512>}, {pipeline_mode = #tpu.pipeline_mode<synchronous>, transform_indices = @transform_4, window_bounds = array<i64: 16, 512>}, {transform_indices = @transform_5, window_bounds = array<i64: 1, 16, 128>}, {transform_indices = @transform_6, window_bounds = array<i64: 1, 16, 128>}]} {
    %c0_i32 = arith.constant 0 : i32
    %0 = arith.cmpi eq, %arg1, %c0_i32 : i32
    %1 = arith.extui %0 : i1 to i32
    %c0_i32_0 = arith.constant 0 : i32
    %2 = arith.cmpi ne, %1, %c0_i32_0 : i32
    scf.if %2 {
      %c0_33 = arith.constant 0 : index
      %c0_34 = arith.constant 0 : index
      %61 = vector.load %arg2[%c0_33, %c0_34] : memref<16x128xf32, #tpu.memory_space<vmem>>, vector<16x128xf32>
      %c0_35 = arith.constant 0 : index
      %c0_36 = arith.constant 0 : index
      %62 = vector.load %arg9[%c0_35, %c0_36] : memref<16x128xf32, #tpu.memory_space<vmem>>, vector<16x128xf32>
      tpu.vector_store %arg9[%c0_35, %c0_36], %61 {strides = array<i32>} : memref<16x128xf32, #tpu.memory_space<vmem>>, vector<16x128xf32>,
    } else {
    }
    %c0 = arith.constant 0 : index
    %c0_1 = arith.constant 0 : index
    %c0_2 = arith.constant 0 : index
    %3 = vector.load %arg3[%c0, %c0_1, %c0_2] : memref<1x16x128xbf16, #tpu.memory_space<vmem>>, vector<1x16x128xbf16>
    %4 = vector.shape_cast %3 : vector<1x16x128xbf16> to vector<16x128xbf16>
    %c0_3 = arith.constant 0 : index
    %c0_4 = arith.constant 0 : index
    %5 = vector.load %arg4[%c0_3, %c0_4] : memref<128x512xbf16, #tpu.memory_space<vmem>>, vector<128x512xbf16>
    %cst = arith.constant dense<0.000000e+00> : vector<16x512xf32>
    %6 = tpu.matmul %4, %5, %cst {dimension_numbers = #tpu.dot_dimension_numbers<[1], [0], [0], [1], [0, 0, 1, 1], [], []>} : vector<16x128xbf16>, vector<128x512xbf16>, vector<16x512xf32> -> vector<16x512xf32>
    %7 = vector.shape_cast %6 : vector<16x512xf32> to vector<1x16x512xf32>
    %c0_5 = arith.constant 0 : index
    %c0_6 = arith.constant 0 : index
    %c0_7 = arith.constant 0 : index
    %8 = vector.load %arg10[%c0_5, %c0_6, %c0_7] : memref<1x16x512xf32, #tpu.memory_space<vmem>>, vector<1x16x512xf32>
    tpu.vector_store %arg10[%c0_5, %c0_6, %c0_7], %7 {strides = array<i32>} : memref<1x16x512xf32, #tpu.memory_space<vmem>>, vector<1x16x512xf32>,
    %c0_8 = arith.constant 0 : index
    %c0_9 = arith.constant 0 : index
    %9 = vector.load %arg6[%c0_8, %c0_9] : memref<16x512xf32, #tpu.memory_space<vmem>>, vector<16x512xf32>
    %c0_10 = arith.constant 0 : index
    %c0_11 = arith.constant 0 : index
    %10 = vector.load %arg9[%c0_10, %c0_11] : memref<16x128xf32, #tpu.memory_space<vmem>>, vector<16x128xf32>
    %c0_i32_12 = arith.constant 0 : i32
    %11 = arith.index_cast %c0_i32_12 : i32 to index
    %c0_13 = arith.constant 0 : index
    %c0_14 = arith.constant 0 : index
    %12 = vector.load %arg10[%11, %c0_13, %c0_14] : memref<1x16x512xf32, #tpu.memory_space<vmem>>, vector<1x16x512xf32>
    %13 = vector.shape_cast %12 : vector<1x16x512xf32> to vector<16x512xf32>
    %14 = arith.truncf %10 : vector<16x128xf32> to vector<16x128xbf16>
    %c0_15 = arith.constant 0 : index
    %c0_16 = arith.constant 0 : index
    %15 = vector.load %arg5[%c0_15, %c0_16] : memref<128x512xbf16, #tpu.memory_space<vmem>>, vector<128x512xbf16>
    %cst_17 = arith.constant dense<0.000000e+00> : vector<16x512xf32>
    %16 = tpu.matmul %14, %15, %cst_17 {dimension_numbers = #tpu.dot_dimension_numbers<[1], [0], [0], [1], [0, 0, 1, 1], [], []>} : vector<16x128xbf16>, vector<128x512xbf16>, vector<16x512xf32> -> vector<16x512xf32>
    %17 = arith.addf %13, %16 : vector<16x512xf32>
    %18 = arith.addf %17, %9 : vector<16x512xf32>
    %19 = vector.extract_strided_slice %18 {offsets = [0, 128], sizes = [16, 128], strides = [1, 1]} : vector<16x512xf32> to vector<16x128xf32>
    %cst_18 = arith.constant 5.000000e-01 : f32
    %20 = vector.broadcast %cst_18 : f32 to vector<16x128xf32>
    %21 = arith.mulf %20, %19 : vector<16x128xf32>
    %22 = math.tanh %21 : vector<16x128xf32>
    %cst_19 = arith.constant 1.000000e+00 : f32
    %23 = vector.broadcast %cst_19 : f32 to vector<16x128xf32>
    %24 = arith.addf %22, %23 : vector<16x128xf32>
    %cst_20 = arith.constant 5.000000e-01 : f32
    %25 = vector.broadcast %cst_20 : f32 to vector<16x128xf32>
    %26 = arith.mulf %25, %24 : vector<16x128xf32>
    %27 = arith.mulf %26, %10 : vector<16x128xf32>
    %28 = vector.extract_strided_slice %18 {offsets = [0, 0], sizes = [16, 128], strides = [1, 1]} : vector<16x512xf32> to vector<16x128xf32>
    %cst_21 = arith.constant 5.000000e-01 : f32
    %29 = vector.broadcast %cst_21 : f32 to vector<16x128xf32>
    %30 = arith.mulf %29, %28 : vector<16x128xf32>
    %31 = math.tanh %30 : vector<16x128xf32>
    %cst_22 = arith.constant 1.000000e+00 : f32
    %32 = vector.broadcast %cst_22 : f32 to vector<16x128xf32>
    %33 = arith.addf %31, %32 : vector<16x128xf32>
    %cst_23 = arith.constant 5.000000e-01 : f32
    %34 = vector.broadcast %cst_23 : f32 to vector<16x128xf32>
    %35 = arith.mulf %34, %33 : vector<16x128xf32>
    %36 = vector.extract_strided_slice %18 {offsets = [0, 256], sizes = [16, 128], strides = [1, 1]} : vector<16x512xf32> to vector<16x128xf32>
    %37 = math.tanh %36 : vector<16x128xf32>
    %38 = arith.mulf %35, %37 : vector<16x128xf32>
    %39 = arith.addf %27, %38 : vector<16x128xf32>
    %40 = vector.extract_strided_slice %18 {offsets = [0, 384], sizes = [16, 128], strides = [1, 1]} : vector<16x512xf32> to vector<16x128xf32>
    %cst_24 = arith.constant 5.000000e-01 : f32
    %41 = vector.broadcast %cst_24 : f32 to vector<16x128xf32>
    %42 = arith.mulf %41, %40 : vector<16x128xf32>
    %43 = math.tanh %42 : vector<16x128xf32>
    %cst_25 = arith.constant 1.000000e+00 : f32
    %44 = vector.broadcast %cst_25 : f32 to vector<16x128xf32>
    %45 = arith.addf %43, %44 : vector<16x128xf32>
    %cst_26 = arith.constant 5.000000e-01 : f32
    %46 = vector.broadcast %cst_26 : f32 to vector<16x128xf32>
    %47 = arith.mulf %46, %45 : vector<16x128xf32>
    %48 = math.tanh %39 : vector<16x128xf32>
    %49 = arith.mulf %47, %48 : vector<16x128xf32>
    %50 = arith.truncf %49 : vector<16x128xf32> to vector<16x128xbf16>
    %51 = arith.index_cast %c0_i32_12 : i32 to index
    %c0_27 = arith.constant 0 : index
    %c0_28 = arith.constant 0 : index
    %52 = vector.load %arg7[%51, %c0_27, %c0_28] : memref<1x16x128xbf16, #tpu.memory_space<vmem>>, vector<1x16x128xbf16>
    %53 = vector.shape_cast %52 : vector<1x16x128xbf16> to vector<16x128xbf16>
    %54 = vector.shape_cast %50 : vector<16x128xbf16> to vector<1x16x128xbf16>
    tpu.vector_store %arg7[%51, %c0_27, %c0_28], %54 {strides = array<i32>} : memref<1x16x128xbf16, #tpu.memory_space<vmem>>, vector<1x16x128xbf16>,
    %55 = arith.truncf %39 : vector<16x128xf32> to vector<16x128xbf16>
    %56 = arith.index_cast %c0_i32_12 : i32 to index
    %c0_29 = arith.constant 0 : index
    %c0_30 = arith.constant 0 : index
    %57 = vector.load %arg8[%56, %c0_29, %c0_30] : memref<1x16x128xbf16, #tpu.memory_space<vmem>>, vector<1x16x128xbf16>
    %58 = vector.shape_cast %57 : vector<1x16x128xbf16> to vector<16x128xbf16>
    %59 = vector.shape_cast %55 : vector<16x128xbf16> to vector<1x16x128xbf16>
    tpu.vector_store %arg8[%56, %c0_29, %c0_30], %59 {strides = array<i32>} : memref<1x16x128xbf16, #tpu.memory_space<vmem>>, vector<1x16x128xbf16>,
    %c1_i32 = arith.constant 1 : i32
    %c0_31 = arith.constant 0 : index
    %c0_32 = arith.constant 0 : index
    %60 = vector.load %arg9[%c0_31, %c0_32] : memref<16x128xf32, #tpu.memory_space<vmem>>, vector<16x128xf32>
    tpu.vector_store %arg9[%c0_31, %c0_32], %49 {strides = array<i32>} : memref<16x128xf32, #tpu.memory_space<vmem>>, vector<16x128xf32>,
    return
  }
  func.func @transform_0(%arg0: i32, %arg1: i32) -> (i32, i32) {
    %c0_i32 = arith.constant 0 : i32
    %c0_i32_0 = arith.constant 0 : i32
    return %arg0, %c0_i32 : i32, i32
  }
  func.func @transform_1(%arg0: i32, %arg1: i32) -> (i32, i32, i32) {
    %c0_i32 = arith.constant 0 : i32
    %c0_i32_0 = arith.constant 0 : i32
    return %arg1, %arg0, %c0_i32 : i32, i32, i32
  }
  func.func @transform_2(%arg0: i32, %arg1: i32) -> (i32, i32) {
    %c0_i32 = arith.constant 0 : i32
    %c0_i32_0 = arith.constant 0 : i32
    %c0_i32_1 = arith.constant 0 : i32
    return %c0_i32, %c0_i32_0 : i32, i32
  }
  func.func @transform_3(%arg0: i32, %arg1: i32) -> (i32, i32) {
    %c0_i32 = arith.constant 0 : i32
    %c0_i32_0 = arith.constant 0 : i32
    %c0_i32_1 = arith.constant 0 : i32
    return %c0_i32, %c0_i32_0 : i32, i32
  }
  func.func @transform_4(%arg0: i32, %arg1: i32) -> (i32, i32) {
    %c0_i32 = arith.constant 0 : i32
    %c0_i32_0 = arith.constant 0 : i32
    %c0_i32_1 = arith.constant 0 : i32
    return %c0_i32, %c0_i32_0 : i32, i32
  }
  func.func @transform_5(%arg0: i32, %arg1: i32) -> (i32, i32, i32) {
    %c0_i32 = arith.constant 0 : i32
    %c0_i32_0 = arith.constant 0 : i32
    return %arg1, %arg0, %c0_i32 : i32, i32, i32
  }
  func.func @transform_6(%arg0: i32, %arg1: i32) -> (i32, i32, i32) {
    %c0_i32 = arith.constant 0 : i32
    %c0_i32_0 = arith.constant 0 : i32
    return %arg1, %arg0, %c0_i32 : i32, i32, i32
  }
}

module attributes {stable_mosaic.version = 11 : i64} {
  func.func @_lstm_chunk_kernel(%arg0: i32, %arg1: i32, %arg2: memref<16x128xf32, #tpu.memory_space<vmem>>, %arg3: memref<1x16x128xbf16, #tpu.memory_space<vmem>>, %arg4: memref<128x512xbf16, #tpu.memory_space<vmem>>, %arg5: memref<128x512xbf16, #tpu.memory_space<vmem>>, %arg6: memref<16x512xf32, #tpu.memory_space<vmem>>, %arg7: memref<1x16x128xbf16, #tpu.memory_space<vmem>>, %arg8: memref<1x16x128xbf16, #tpu.memory_space<vmem>>, %arg9: memref<16x128xf32, #tpu.memory_space<vmem>>, %arg10: memref<1x16x512xf32, #tpu.memory_space<vmem>>) attributes {dimension_semantics = [#tpu.dimension_semantics<parallel>, #tpu.dimension_semantics<arbitrary>], iteration_bounds = array<i64: 1, 1>, scalar_prefetch = 0 : i64, scratch_operands = 2 : i64, tpu.core_type = #tpu.core_type<tc>, window_params = [{transform_indices = @transform_0, window_bounds = array<i64: 16, 128>}, {transform_indices = @transform_1, window_bounds = array<i64: 1, 16, 128>}, {pipeline_mode = #tpu.pipeline_mode<synchronous>, transform_indices = @transform_2, window_bounds = array<i64: 128, 512>}, {pipeline_mode = #tpu.pipeline_mode<synchronous>, transform_indices = @transform_3, window_bounds = array<i64: 128, 512>}, {pipeline_mode = #tpu.pipeline_mode<synchronous>, transform_indices = @transform_4, window_bounds = array<i64: 16, 512>}, {transform_indices = @transform_5, window_bounds = array<i64: 1, 16, 128>}, {transform_indices = @transform_6, window_bounds = array<i64: 1, 16, 128>}]} {
    %c0_i32 = arith.constant 0 : i32
    %0 = arith.cmpi eq, %arg1, %c0_i32 : i32
    %1 = arith.extui %0 : i1 to i32
    %c0_i32_0 = arith.constant 0 : i32
    %2 = arith.cmpi ne, %1, %c0_i32_0 : i32
    scf.if %2 {
      %c0_33 = arith.constant 0 : index
      %c0_34 = arith.constant 0 : index
      %61 = vector.load %arg2[%c0_33, %c0_34] : memref<16x128xf32, #tpu.memory_space<vmem>>, vector<16x128xf32>
      %c0_35 = arith.constant 0 : index
      %c0_36 = arith.constant 0 : index
      %62 = vector.load %arg9[%c0_35, %c0_36] : memref<16x128xf32, #tpu.memory_space<vmem>>, vector<16x128xf32>
      tpu.vector_store %arg9[%c0_35, %c0_36], %61 {strides = array<i32>} : memref<16x128xf32, #tpu.memory_space<vmem>>, vector<16x128xf32>,
    } else {
    }
    %c0 = arith.constant 0 : index
    %c0_1 = arith.constant 0 : index
    %c0_2 = arith.constant 0 : index
    %3 = vector.load %arg3[%c0, %c0_1, %c0_2] : memref<1x16x128xbf16, #tpu.memory_space<vmem>>, vector<1x16x128xbf16>
    %4 = vector.shape_cast %3 : vector<1x16x128xbf16> to vector<16x128xbf16>
    %c0_3 = arith.constant 0 : index
    %c0_4 = arith.constant 0 : index
    %5 = vector.load %arg4[%c0_3, %c0_4] : memref<128x512xbf16, #tpu.memory_space<vmem>>, vector<128x512xbf16>
    %cst = arith.constant dense<0.000000e+00> : vector<16x512xf32>
    %6 = tpu.matmul %4, %5, %cst {dimension_numbers = #tpu.dot_dimension_numbers<[1], [0], [0], [1], [0, 0, 1, 1], [], []>} : vector<16x128xbf16>, vector<128x512xbf16>, vector<16x512xf32> -> vector<16x512xf32>
    %7 = vector.shape_cast %6 : vector<16x512xf32> to vector<1x16x512xf32>
    %c0_5 = arith.constant 0 : index
    %c0_6 = arith.constant 0 : index
    %c0_7 = arith.constant 0 : index
    %8 = vector.load %arg10[%c0_5, %c0_6, %c0_7] : memref<1x16x512xf32, #tpu.memory_space<vmem>>, vector<1x16x512xf32>
    tpu.vector_store %arg10[%c0_5, %c0_6, %c0_7], %7 {strides = array<i32>} : memref<1x16x512xf32, #tpu.memory_space<vmem>>, vector<1x16x512xf32>,
    %c0_8 = arith.constant 0 : index
    %c0_9 = arith.constant 0 : index
    %9 = vector.load %arg6[%c0_8, %c0_9] : memref<16x512xf32, #tpu.memory_space<vmem>>, vector<16x512xf32>
    %c0_10 = arith.constant 0 : index
    %c0_11 = arith.constant 0 : index
    %10 = vector.load %arg9[%c0_10, %c0_11] : memref<16x128xf32, #tpu.memory_space<vmem>>, vector<16x128xf32>
    %c0_i32_12 = arith.constant 0 : i32
    %11 = arith.index_cast %c0_i32_12 : i32 to index
    %c0_13 = arith.constant 0 : index
    %c0_14 = arith.constant 0 : index
    %12 = vector.load %arg10[%11, %c0_13, %c0_14] : memref<1x16x512xf32, #tpu.memory_space<vmem>>, vector<1x16x512xf32>
    %13 = vector.shape_cast %12 : vector<1x16x512xf32> to vector<16x512xf32>
    %14 = arith.truncf %10 : vector<16x128xf32> to vector<16x128xbf16>
    %c0_15 = arith.constant 0 : index
    %c0_16 = arith.constant 0 : index
    %15 = vector.load %arg5[%c0_15, %c0_16] : memref<128x512xbf16, #tpu.memory_space<vmem>>, vector<128x512xbf16>
    %cst_17 = arith.constant dense<0.000000e+00> : vector<16x512xf32>
    %16 = tpu.matmul %14, %15, %cst_17 {dimension_numbers = #tpu.dot_dimension_numbers<[1], [0], [0], [1], [0, 0, 1, 1], [], []>} : vector<16x128xbf16>, vector<128x512xbf16>, vector<16x512xf32> -> vector<16x512xf32>
    %17 = arith.addf %13, %16 : vector<16x512xf32>
    %18 = arith.addf %17, %9 : vector<16x512xf32>
    %19 = vector.extract_strided_slice %18 {offsets = [0, 128], sizes = [16, 128], strides = [1, 1]} : vector<16x512xf32> to vector<16x128xf32>
    %cst_18 = arith.constant 5.000000e-01 : f32
    %20 = vector.broadcast %cst_18 : f32 to vector<16x128xf32>
    %21 = arith.mulf %20, %19 : vector<16x128xf32>
    %22 = math.tanh %21 : vector<16x128xf32>
    %cst_19 = arith.constant 1.000000e+00 : f32
    %23 = vector.broadcast %cst_19 : f32 to vector<16x128xf32>
    %24 = arith.addf %22, %23 : vector<16x128xf32>
    %cst_20 = arith.constant 5.000000e-01 : f32
    %25 = vector.broadcast %cst_20 : f32 to vector<16x128xf32>
    %26 = arith.mulf %25, %24 : vector<16x128xf32>
    %27 = arith.mulf %26, %10 : vector<16x128xf32>
    %28 = vector.extract_strided_slice %18 {offsets = [0, 0], sizes = [16, 128], strides = [1, 1]} : vector<16x512xf32> to vector<16x128xf32>
    %cst_21 = arith.constant 5.000000e-01 : f32
    %29 = vector.broadcast %cst_21 : f32 to vector<16x128xf32>
    %30 = arith.mulf %29, %28 : vector<16x128xf32>
    %31 = math.tanh %30 : vector<16x128xf32>
    %cst_22 = arith.constant 1.000000e+00 : f32
    %32 = vector.broadcast %cst_22 : f32 to vector<16x128xf32>
    %33 = arith.addf %31, %32 : vector<16x128xf32>
    %cst_23 = arith.constant 5.000000e-01 : f32
    %34 = vector.broadcast %cst_23 : f32 to vector<16x128xf32>
    %35 = arith.mulf %34, %33 : vector<16x128xf32>
    %36 = vector.extract_strided_slice %18 {offsets = [0, 256], sizes = [16, 128], strides = [1, 1]} : vector<16x512xf32> to vector<16x128xf32>
    %37 = math.tanh %36 : vector<16x128xf32>
    %38 = arith.mulf %35, %37 : vector<16x128xf32>
    %39 = arith.addf %27, %38 : vector<16x128xf32>
    %40 = vector.extract_strided_slice %18 {offsets = [0, 384], sizes = [16, 128], strides = [1, 1]} : vector<16x512xf32> to vector<16x128xf32>
    %cst_24 = arith.constant 5.000000e-01 : f32
    %41 = vector.broadcast %cst_24 : f32 to vector<16x128xf32>
    %42 = arith.mulf %41, %40 : vector<16x128xf32>
    %43 = math.tanh %42 : vector<16x128xf32>
    %cst_25 = arith.constant 1.000000e+00 : f32
    %44 = vector.broadcast %cst_25 : f32 to vector<16x128xf32>
    %45 = arith.addf %43, %44 : vector<16x128xf32>
    %cst_26 = arith.constant 5.000000e-01 : f32
    %46 = vector.broadcast %cst_26 : f32 to vector<16x128xf32>
    %47 = arith.mulf %46, %45 : vector<16x128xf32>
    %48 = math.tanh %39 : vector<16x128xf32>
    %49 = arith.mulf %47, %48 : vector<16x128xf32>
    %50 = arith.truncf %49 : vector<16x128xf32> to vector<16x128xbf16>
    %51 = arith.index_cast %c0_i32_12 : i32 to index
    %c0_27 = arith.constant 0 : index
    %c0_28 = arith.constant 0 : index
    %52 = vector.load %arg7[%51, %c0_27, %c0_28] : memref<1x16x128xbf16, #tpu.memory_space<vmem>>, vector<1x16x128xbf16>
    %53 = vector.shape_cast %52 : vector<1x16x128xbf16> to vector<16x128xbf16>
    %54 = vector.shape_cast %50 : vector<16x128xbf16> to vector<1x16x128xbf16>
    tpu.vector_store %arg7[%51, %c0_27, %c0_28], %54 {strides = array<i32>} : memref<1x16x128xbf16, #tpu.memory_space<vmem>>, vector<1x16x128xbf16>,
    %55 = arith.truncf %39 : vector<16x128xf32> to vector<16x128xbf16>
    %56 = arith.index_cast %c0_i32_12 : i32 to index
    %c0_29 = arith.constant 0 : index
    %c0_30 = arith.constant 0 : index
    %57 = vector.load %arg8[%56, %c0_29, %c0_30] : memref<1x16x128xbf16, #tpu.memory_space<vmem>>, vector<1x16x128xbf16>
    %58 = vector.shape_cast %57 : vector<1x16x128xbf16> to vector<16x128xbf16>
    %59 = vector.shape_cast %55 : vector<16x128xbf16> to vector<1x16x128xbf16>
    tpu.vector_store %arg8[%56, %c0_29, %c0_30], %59 {strides = array<i32>} : memref<1x16x128xbf16, #tpu.memory_space<vmem>>, vector<1x16x128xbf16>,
    %c1_i32 = arith.constant 1 : i32
    %c0_31 = arith.constant 0 : index
    %c0_32 = arith.constant 0 : index
    %60 = vector.load %arg9[%c0_31, %c0_32] : memref<16x128xf32, #tpu.memory_space<vmem>>, vector<16x128xf32>
    tpu.vector_store %arg9[%c0_31, %c0_32], %49 {strides = array<i32>} : memref<16x128xf32, #tpu.memory_space<vmem>>, vector<16x128xf32>,
    return
  }
  func.func @transform_0(%arg0: i32, %arg1: i32) -> (i32, i32) {
    %c0_i32 = arith.constant 0 : i32
    %c0_i32_0 = arith.constant 0 : i32
    return %arg0, %c0_i32 : i32, i32
  }
  func.func @transform_1(%arg0: i32, %arg1: i32) -> (i32, i32, i32) {
    %c0_i32 = arith.constant 0 : i32
    %c0_i32_0 = arith.constant 0 : i32
    return %arg1, %arg0, %c0_i32 : i32, i32, i32
  }
  func.func @transform_2(%arg0: i32, %arg1: i32) -> (i32, i32) {
    %c0_i32 = arith.constant 0 : i32
    %c0_i32_0 = arith.constant 0 : i32
    %c0_i32_1 = arith.constant 0 : i32
    return %c0_i32, %c0_i32_0 : i32, i32
  }
  func.func @transform_3(%arg0: i32, %arg1: i32) -> (i32, i32) {
    %c0_i32 = arith.constant 0 : i32
    %c0_i32_0 = arith.constant 0 : i32
    %c0_i32_1 = arith.constant 0 : i32
    return %c0_i32, %c0_i32_0 : i32, i32
  }
  func.func @transform_4(%arg0: i32, %arg1: i32) -> (i32, i32) {
    %c0_i32 = arith.constant 0 : i32
    %c0_i32_0 = arith.constant 0 : i32
    %c0_i32_1 = arith.constant 0 : i32
    return %c0_i32, %c0_i32_0 : i32, i32
  }
  func.func @transform_5(%arg0: i32, %arg1: i32) -> (i32, i32, i32) {
    %c0_i32 = arith.constant 0 : i32
    %c0_i32_0 = arith.constant 0 : i32
    return %arg1, %arg0, %c0_i32 : i32, i32, i32
  }
  func.func @transform_6(%arg0: i32, %arg1: i32) -> (i32, i32, i32) {
    %c0_i32 = arith.constant 0 : i32
    %c0_i32_0 = arith.constant 0 : i32
    return %arg1, %arg0, %c0_i32 : i32, i32, i32
  }
}

</mosaic_0001>

<bundles_post_ra>
// kernel: tpu_custom_call.1
= control target key start
LH: loop header
LB: loop body
LE: loop exit
PB: predicated region body
PF: predicated region fallthrough
CT: control target
= control target key end

     0   :  { %12 = vsyncpa [#allocation5], 0  ;;  %s1260_s0 = inlined_call_operand.hbm [shape: f32[16,128], index: 0, kind: input, shape index: {}]   ;;  %s1261_s1 = inlined_call_operand.hbm [shape: bf16[1,16,128], index: 1, kind: input, shape index: {}]   ;;  %s1262_s2 = inlined_call_operand.hbm [shape: bf16[128,512], index: 2, kind: input, shape index: {}]   ;;  %s1263_s3 = inlined_call_operand.hbm [shape: bf16[128,512], index: 3, kind: input, shape index: {}]   ;;  %s1264_s4 = inlined_call_operand.hbm [shape: f32[16,512], index: 4, kind: input, shape index: {}]   ;;  %s1265_s5 = inlined_call_operand.hbm [shape: bf16[1,16,128], index: 5, kind: output, shape index: {0}]   ;;  %s1266_s6 = inlined_call_operand.hbm [shape: bf16[1,16,128], index: 6, kind: output, shape index: {1}]  }
   0x1   :  { %13 = vsyncpa [#allocation8], 0 }
   0x2   :  { %14 = vsyncpa [#allocation11], 0 }
   0x3   :  { %15 = vsyncpa [#allocation6], 0 }
   0x4   :  { %16 = vsyncpa [#allocation15], 0  ;;  %s1167_s21 = smov [#allocation7]  }
   0x5   :  { %s34_s22 = sshll.u32 %s1167_s21, 4  ;;  %s35_s22 = int_to_ptr.vmem [resolvable:$true] %s34_s22 }
   0x6   :  { %s1025_s23 = scalar_lea.vmem %s35_s22, 128  ;;  %p1030_p1 = scmp.lt.s32.totalorder %s35_s22, %s35_s22 }
   0x7   :  { %p1026_p0 = scmp.ne.s32.totalorder %s35_s22, %s1025_s23  ;;  %p1031_p2 = scmp.lt.s32.totalorder %s1025_s23, %s1025_s23 }
   0x9   :  { %p1032_p3 = por %p1031_p2, %p1030_p1 }
   0xb   :  { %p1033_p4 = pnand %p1032_p3, %p1026_p0 }
   0xd   :  { %1036 = shalt.err (!%p1033_p4)
}
   0xe   :  { %s1168_s24 = smov 64   ;;  %s1169_s25 = smov 4  }
   0xf   :  { %40 = dma.hbm_to_vmem [thread:$0]  %s1261_s1, 128, %s35_s22, [#allocation8], %s1168_s24, %s1168_s24, %s1169_s25  }
  0x10   :  { %s1170_s28 = smov [#allocation10]   ;;  %s1171_s30 = smov [#allocation4]  }
  0x11   :  { %s58_s29 = sshll.u32 %s1170_s28, 4  ;;  %s22_s7 = sshll.u32 %s1171_s30, 4  ;;  %s59_s29 = int_to_ptr.vmem [resolvable:$true] %s58_s29  ;;  %s23_s7 = int_to_ptr.vmem [resolvable:$true] %s22_s7 }
  0x12   :  { %s1045_s8 = scalar_lea.vmem %s59_s29, 4096  ;;  %p1050_p6 = scmp.lt.s32.totalorder %s59_s29, %s59_s29 }
  0x13   :  { %p1046_p5 = scmp.ne.s32.totalorder %s59_s29, %s1045_s8  ;;  %p1051_p7 = scmp.lt.s32.totalorder %s1045_s8, %s1045_s8 }
  0x15   :  { %p1052_p8 = por %p1051_p7, %p1050_p6 }
  0x17   :  { %p1053_p9 = pnand %p1052_p8, %p1046_p5 }
  0x19   :  { %1056 = shalt.err (!%p1053_p9)
}
  0x1a   :  { %s1172_s9 = smov 256   ;;  %s1173_s10 = smov 16  }
  0x1b   :  { %64 = dma.hbm_to_vmem [thread:$0]  %s1263_s3, 4096, %s59_s29, [#allocation11], %s1172_s9, %s1172_s9, %s1173_s10  }
  0x1c   :  { %s1065_s1 = scalar_lea.vmem %s23_s7, 256  ;;  %p1070_p11 = scmp.lt.s32.totalorder %s23_s7, %s23_s7 }
  0x1d   :  { %p1066_p10 = scmp.ne.s32.totalorder %s23_s7, %s1065_s1  ;;  %p1071_p12 = scmp.lt.s32.totalorder %s1065_s1, %s1065_s1 }
  0x1f   :  { %p1072_p13 = por %p1071_p12, %p1070_p11 }
  0x21   :  { %p1073_p0 = pnand %p1072_p13, %p1066_p10 }
  0x23   :  { %1076 = shalt.err (!%p1073_p0)
}
  0x24   :  { %s1174_s13 = smov 128   ;;  %s1175_s14 = smov 8  }
  0x25   :  { %28 = dma.hbm_to_vmem [thread:$0]  %s1260_s0, 256, %s23_s7, [#allocation5], %s1174_s13, %s1174_s13, %s1175_s14  }
  0x26   :  { %s1176_s17 = smov [#allocation9]   ;;  %s1177_s19 = smov [#allocation12]  }
  0x27   :  { %s46_s18 = sshll.u32 %s1176_s17, 4  ;;  %s70_s20 = sshll.u32 %s1177_s19, 4  ;;  %s47_s18 = int_to_ptr.vmem [resolvable:$true] %s46_s18  ;;  %s71_s20 = int_to_ptr.vmem [resolvable:$true] %s70_s20 }
  0x28   :  { %s1085_s3 = scalar_lea.vmem %s47_s18, 4096  ;;  %p1090_p2 = scmp.lt.s32.totalorder %s47_s18, %s47_s18 }
  0x29   :  { %p1086_p1 = scmp.ne.s32.totalorder %s47_s18, %s1085_s3  ;;  %p1091_p3 = scmp.lt.s32.totalorder %s1085_s3, %s1085_s3 }
  0x2b   :  { %p1092_p4 = por %p1091_p3, %p1090_p2 }
  0x2d   :  { %p1093_p5 = pnand %p1092_p4, %p1086_p1 }
  0x2f   :  { %1096 = shalt.err (!%p1093_p5)
}
  0x30   :  { %52 = dma.hbm_to_vmem [thread:$0]  %s1262_s2, 4096, %s47_s18, [#allocation8], %s1172_s9, %s1172_s9, %s1173_s10  }
  0x31   :  { %s1105_s23 = scalar_lea.vmem %s71_s20, 1024  ;;  %p1110_p7 = scmp.lt.s32.totalorder %s71_s20, %s71_s20 }
  0x32   :  { %p1106_p6 = scmp.ne.s32.totalorder %s71_s20, %s1105_s23  ;;  %p1111_p8 = scmp.lt.s32.totalorder %s1105_s23, %s1105_s23 }
  0x34   :  { %p1112_p9 = por %p1111_p8, %p1110_p7 }
  0x36   :  { %p1113_p10 = pnand %p1112_p9, %p1106_p6 }
  0x38   :  { %1116 = shalt.err (!%p1113_p10)
}
  0x39   :  { %s1178_s0 = smov 512   ;;  %s1179_s26 = smov 32  }
  0x3a   :  { %76 = dma.hbm_to_vmem [thread:$0]  %s1264_s4, 1024, %s71_s20, [#allocation11], %s1178_s0, %s1178_s0, %s1179_s26  }
  0x3b   :  { %1157 = dma.done.wait [#allocation5], 256  }
  0x3c   :  { %1158 = vsyncadd [#allocation5], 4294967040 }
  0x3d   :  { %1159 = dma.done.wait [#allocation8], 4224  }
  0x3e   :  { %1160 = vsyncadd [#allocation8], 4294963072 }
  0x3f   :  { %1161 = dma.done.wait [#allocation11], 5120  }
  0x40   :  { %1162 = vsyncadd [#allocation11], 4294962176  ;;  %v1180_v0 = vmov 0   ;;  %v900_v1 = vld [vmem:[#allocation9 + $0xe4] ss:$16 sps:$4 sm:$0xff]   ;;  %v948_v35 = vld [vmem:[#allocation7] sm:$0xff]  }
  0x41   :  { %333 = vmatprep.mubr.bf16.mxu0 %v1180_v0  ;;  %376 = vmatprep.mubr.bf16.mxu1 %v1180_v0  ;;  %v902_v2 = vld [vmem:[#allocation9 + $0xec] ss:$16 sps:$4 sm:$0xff]   ;;  %v904_v3 = vld [vmem:[#allocation9 + $0xe0] ss:$16 sps:$4 sm:$0xff]   ;;  %v905_v4 = vld [vmem:[#allocation9 + $0xe8] ss:$16 sps:$4 sm:$0xff]  }
  0x42   :  { %301 = vmatprep.subr.bf16.mxu0 %v900_v1  ;;  %344 = vmatprep.subr.bf16.mxu1 %v902_v2  ;;  %v906_v5 = vld [vmem:[#allocation9 + $0xc4] ss:$16 sps:$4 sm:$0xff]   ;;  %v908_v6 = vld [vmem:[#allocation9 + $0xcc] ss:$16 sps:$4 sm:$0xff]   ;;  %v910_v7 = vld [vmem:[#allocation9 + $0xc0] ss:$16 sps:$4 sm:$0xff]  }
  0x43   :  { %302 = vmatpush1.bf16.msra.mxu0 %v904_v3  ;;  %345 = vmatpush1.bf16.msra.mxu1 %v905_v4  ;;  %v911_v8 = vld [vmem:[#allocation9 + $0xc8] ss:$16 sps:$4 sm:$0xff]   ;;  %v912_v9 = vld [vmem:[#allocation9 + $0xa4] ss:$16 sps:$4 sm:$0xff]   ;;  %v914_v10 = vld [vmem:[#allocation9 + $0xac] ss:$16 sps:$4 sm:$0xff]  }
  0x44   :  { %303 = vmatprep.subr.bf16.mxu0 %v906_v5  ;;  %346 = vmatprep.subr.bf16.mxu1 %v908_v6  ;;  %v916_v11 = vld [vmem:[#allocation9 + $0xa0] ss:$16 sps:$4 sm:$0xff]   ;;  %v917_v12 = vld [vmem:[#allocation9 + $0xa8] ss:$16 sps:$4 sm:$0xff]   ;;  %v918_v13 = vld [vmem:[#allocation9 + $0x84] ss:$16 sps:$4 sm:$0xff]  }
  0x45   :  { %v920_v14 = vld [vmem:[#allocation9 + $0x8c] ss:$16 sps:$4 sm:$0xff]   ;;  %v922_v15 = vld [vmem:[#allocation9 + $0x80] ss:$16 sps:$4 sm:$0xff]   ;;  %v923_v16 = vld [vmem:[#allocation9 + $0x88] ss:$16 sps:$4 sm:$0xff]  }
  0x46   :  { %v924_v17 = vld [vmem:[#allocation9 + $0x64] ss:$16 sps:$4 sm:$0xff]   ;;  %v926_v18 = vld [vmem:[#allocation9 + $0x6c] ss:$16 sps:$4 sm:$0xff]   ;;  %v928_v19 = vld [vmem:[#allocation9 + $0x60] ss:$16 sps:$4 sm:$0xff]  }
  0x47   :  { %304 = vmatpush1.bf16.msra.mxu0 %v910_v7  ;;  %347 = vmatpush1.bf16.msra.mxu1 %v911_v8  ;;  %v929_v20 = vld [vmem:[#allocation9 + $0x68] ss:$16 sps:$4 sm:$0xff]   ;;  %v930_v21 = vld [vmem:[#allocation9 + $0x44] ss:$16 sps:$4 sm:$0xff]   ;;  %v932_v22 = vld [vmem:[#allocation9 + $0x4c] ss:$16 sps:$4 sm:$0xff]  }
  0x48   :  { %305 = vmatprep.subr.bf16.mxu0 %v912_v9  ;;  %348 = vmatprep.subr.bf16.mxu1 %v914_v10  ;;  %v934_v23 = vld [vmem:[#allocation9 + $0x40] ss:$16 sps:$4 sm:$0xff]   ;;  %v935_v24 = vld [vmem:[#allocation9 + $0x48] ss:$16 sps:$4 sm:$0xff]   ;;  %v936_v25 = vld [vmem:[#allocation9 + $0x24] ss:$16 sps:$4 sm:$0xff]  }
  0x49   :  { %v938_v26 = vld [vmem:[#allocation9 + $0x2c] ss:$16 sps:$4 sm:$0xff]   ;;  %v940_v27 = vld [vmem:[#allocation9 + $0x20] ss:$16 sps:$4 sm:$0xff]   ;;  %v941_v28 = vld [vmem:[#allocation9 + $0x28] ss:$16 sps:$4 sm:$0xff]  }
  0x4a   :  { %v942_v29 = vld [vmem:[#allocation9 + $0x4] ss:$16 sps:$4 sm:$0xff]   ;;  %v944_v30 = vld [vmem:[#allocation9 + $0xc] ss:$16 sps:$4 sm:$0xff]   ;;  %v946_v31 = vld [vmem:[#allocation9] ss:$16 sps:$4 sm:$0xff]  }
  0x4b   :  { %306 = vmatpush1.bf16.msra.mxu0 %v916_v11  ;;  %349 = vmatpush1.bf16.msra.mxu1 %v917_v12  ;;  %v947_v32 = vld [vmem:[#allocation9 + $0x8] ss:$16 sps:$4 sm:$0xff]   ;;  %v951_v33 = vld [vmem:[#allocation10 + $0xe4] ss:$16 sps:$4 sm:$0xff]   ;;  %v954_v34 = vld [vmem:[#allocation10 + $0xec] ss:$16 sps:$4 sm:$0xff]  }
  0x4c   :  { %307 = vmatprep.subr.bf16.mxu0 %v918_v13  ;;  %350 = vmatprep.subr.bf16.mxu1 %v920_v14  ;;  %v949_v36 = vld [vmem:[#allocation10 + $0xe0] ss:$16 sps:$4 sm:$0xff]   ;;  %v952_v37 = vld [vmem:[#allocation10 + $0xe8] ss:$16 sps:$4 sm:$0xff]   ;;  %v957_v38 = vld [vmem:[#allocation10 + $0xc4] ss:$16 sps:$4 sm:$0xff]  }
  0x4d   :  { %v960_v39 = vld [vmem:[#allocation10 + $0xcc] ss:$16 sps:$4 sm:$0xff]   ;;  %v955_v40 = vld [vmem:[#allocation10 + $0xc0] ss:$16 sps:$4 sm:$0xff]   ;;  %v958_v41 = vld [vmem:[#allocation10 + $0xc8] ss:$16 sps:$4 sm:$0xff]  }
  0x4e   :  { %v963_v42 = vld [vmem:[#allocation10 + $0xa4] ss:$16 sps:$4 sm:$0xff]   ;;  %v966_v43 = vld [vmem:[#allocation10 + $0xac] ss:$16 sps:$4 sm:$0xff]   ;;  %v961_v44 = vld [vmem:[#allocation10 + $0xa0] ss:$16 sps:$4 sm:$0xff]  }
  0x4f   :  { %308 = vmatpush1.bf16.msra.mxu0 %v922_v15  ;;  %351 = vmatpush1.bf16.msra.mxu1 %v923_v16  ;;  %v964_v45 = vld [vmem:[#allocation10 + $0xa8] ss:$16 sps:$4 sm:$0xff]   ;;  %v969_v46 = vld [vmem:[#allocation10 + $0x84] ss:$16 sps:$4 sm:$0xff]   ;;  %v972_v47 = vld [vmem:[#allocation10 + $0x8c] ss:$16 sps:$4 sm:$0xff]  }
  0x50   :  { %309 = vmatprep.subr.bf16.mxu0 %v924_v17  ;;  %352 = vmatprep.subr.bf16.mxu1 %v926_v18  ;;  %v967_v48 = vld [vmem:[#allocation10 + $0x80] ss:$16 sps:$4 sm:$0xff]   ;;  %v970_v49 = vld [vmem:[#allocation10 + $0x88] ss:$16 sps:$4 sm:$0xff]   ;;  %v975_v50 = vld [vmem:[#allocation10 + $0x64] ss:$16 sps:$4 sm:$0xff]  }
  0x51   :  { %v978_v51 = vld [vmem:[#allocation10 + $0x6c] ss:$16 sps:$4 sm:$0xff]   ;;  %v973_v52 = vld [vmem:[#allocation10 + $0x60] ss:$16 sps:$4 sm:$0xff]   ;;  %v976_v53 = vld [vmem:[#allocation10 + $0x68] ss:$16 sps:$4 sm:$0xff]  }
  0x52   :  { %v981_v54 = vld [vmem:[#allocation10 + $0x44] ss:$16 sps:$4 sm:$0xff]   ;;  %v984_v55 = vld [vmem:[#allocation10 + $0x4c] ss:$16 sps:$4 sm:$0xff]   ;;  %v979_v56 = vld [vmem:[#allocation10 + $0x40] ss:$16 sps:$4 sm:$0xff]  }
  0x53   :  { %310 = vmatpush1.bf16.msra.mxu0 %v928_v19  ;;  %353 = vmatpush1.bf16.msra.mxu1 %v929_v20  ;;  %v982_v57 = vld [vmem:[#allocation10 + $0x48] ss:$16 sps:$4 sm:$0xff]   ;;  %v987_v58 = vld [vmem:[#allocation10 + $0x24] ss:$16 sps:$4 sm:$0xff]   ;;  %v990_v59 = vld [vmem:[#allocation10 + $0x2c] ss:$16 sps:$4 sm:$0xff]  }
  0x54   :  { %311 = vmatprep.subr.bf16.mxu0 %v930_v21  ;;  %354 = vmatprep.subr.bf16.mxu1 %v932_v22  ;;  %v985_v60 = vld [vmem:[#allocation10 + $0x20] ss:$16 sps:$4 sm:$0xff]   ;;  %v988_v61 = vld [vmem:[#allocation10 + $0x28] ss:$16 sps:$4 sm:$0xff]   ;;  %v993_v62 = vld [vmem:[#allocation10 + $0x4] ss:$16 sps:$4 sm:$0xff]  }
  0x55   :  { %v996_v63 = vld [vmem:[#allocation10 + $0xc] ss:$16 sps:$4 sm:$0xff]   ;;  %v994_v1 = vld [vmem:[#allocation10 + $0x8] ss:$16 sps:$4 sm:$0xff]   ;;  %v1242_v3 = vld [vmem:[#allocation4 + $0x8] sm:$0xff]  ;;  %s1181_s2 = smov [#allocation14]  }
  0x56   :  { %v1240_v2 = vld [vmem:[#allocation4] sm:$0xff]  ;;  %v395_v13 = vld [vmem:[#allocation12] sm:$0xff]  ;;  %s783_s4 = sshll.u32 %s1181_s2, 4  ;;  %s784_s4 = int_to_ptr.vmem [resolvable:$true] %s783_s4 }
  0x57   :  { %312 = vmatpush1.bf16.msra.mxu0 %v934_v23  ;;  %355 = vmatpush1.bf16.msra.mxu1 %v935_v24  ;;  %v413_v4 = vpack.c.bf16 %v1242_v3, %v1240_v2  ;;  %v396_v17 = vld [vmem:[#allocation12 + $0x8] sm:$0xff]  ;;  %v397_v23 = vld [vmem:[#allocation12 + $0x10] sm:$0xff]  ;;  %s1117_s29 = scalar_lea.vmem %s784_s4, 128  ;;  %p1122_p12 = scmp.lt.s32.totalorder %s784_s4, %s784_s4 }
  0x58   :  { %313 = vmatprep.subr.bf16.mxu0 %v936_v25  ;;  %356 = vmatprep.subr.bf16.mxu1 %v938_v26  ;;  %p1118_p11 = scmp.ne.s32.totalorder %s784_s4, %s1117_s29  ;;  %p1123_p13 = scmp.lt.s32.totalorder %s1117_s29, %s1117_s29 }
  0x5a   :  { %p1124_p0 = por %p1123_p13, %p1122_p12 }
  0x5b   :  { %314 = vmatpush1.bf16.msra.mxu0 %v940_v27  ;;  %357 = vmatpush1.bf16.msra.mxu1 %v941_v28  ;;  %v399_v27 = vld [vmem:[#allocation12 + $0x20] sm:$0xff] }
  0x5c   :  { %315 = vmatprep.subr.bf16.mxu0 %v942_v29  ;;  %358 = vmatprep.subr.bf16.mxu1 %v944_v30  ;;  %v400_v30 = vld [vmem:[#allocation12 + $0x28] sm:$0xff]  ;;  %p1125_p1 = pnand %p1124_p0, %p1118_p11 }
  0x5f   :  { %316 = vmatpush1.bf16.msra.mxu0 %v946_v31  ;;  %359 = vmatpush1.bf16.msra.mxu1 %v947_v32 }
  0x60   :  { %606 = vmatprep.subr.bf16.mxu0 %v951_v33  ;;  %649 = vmatprep.subr.bf16.mxu1 %v954_v34 }
  0x62   :  { %334 = vmatmul.mubr.bf16.vlgmr.msra.gmra.mxu0 %v948_v35  ;;  %377 = vmatmul.mubr.bf16.vlgmr.msra.gmra.mxu1 %v948_v35 }
  0x63   :  { %607 = vmatpush1.bf16.msra.mxu0 %v949_v36  ;;  %650 = vmatpush1.bf16.msra.mxu1 %v952_v37 }
  0x64   :  { %608 = vmatprep.subr.bf16.mxu0 %v957_v38  ;;  %651 = vmatprep.subr.bf16.mxu1 %v960_v39  ;;  %v401_v39 = vld [vmem:[#allocation12 + $0x30] sm:$0xff] }
  0x65   :  { %638 = vmatprep.mubr.bf16.mxu0 %v1180_v0  ;;  %681 = vmatprep.mubr.bf16.mxu1 %v1180_v0  ;;  %v991_v0 = vld [vmem:[#allocation10] ss:$16 sps:$4 sm:$0xff]  }
  0x67   :  { %609 = vmatpush1.bf16.msra.mxu0 %v955_v40  ;;  %652 = vmatpush1.bf16.msra.mxu1 %v958_v41 }
  0x68   :  { %610 = vmatprep.subr.bf16.mxu0 %v963_v42  ;;  %653 = vmatprep.subr.bf16.mxu1 %v966_v43 }
  0x6b   :  { %611 = vmatpush1.bf16.msra.mxu0 %v961_v44  ;;  %654 = vmatpush1.bf16.msra.mxu1 %v964_v45  ;;  %v398_v44 = vld [vmem:[#allocation12 + $0x18] sm:$0xff] }
  0x6c   :  { %612 = vmatprep.subr.bf16.mxu0 %v969_v46  ;;  %655 = vmatprep.subr.bf16.mxu1 %v972_v47  ;;  %v402_v46 = vld [vmem:[#allocation12 + $0x38] sm:$0xff] }
  0x6f   :  { %613 = vmatpush1.bf16.msra.mxu0 %v967_v48  ;;  %656 = vmatpush1.bf16.msra.mxu1 %v970_v49 }
  0x70   :  { %614 = vmatprep.subr.bf16.mxu0 %v975_v50  ;;  %657 = vmatprep.subr.bf16.mxu1 %v978_v51 }
  0x73   :  { %615 = vmatpush1.bf16.msra.mxu0 %v973_v52  ;;  %658 = vmatpush1.bf16.msra.mxu1 %v976_v53 }
  0x74   :  { %616 = vmatprep.subr.bf16.mxu0 %v981_v54  ;;  %659 = vmatprep.subr.bf16.mxu1 %v984_v55 }
  0x77   :  { %617 = vmatpush1.bf16.msra.mxu0 %v979_v56  ;;  %660 = vmatpush1.bf16.msra.mxu1 %v982_v57 }
  0x78   :  { %618 = vmatprep.subr.bf16.mxu0 %v987_v58  ;;  %661 = vmatprep.subr.bf16.mxu1 %v990_v59 }
  0x7b   :  { %619 = vmatpush1.bf16.msra.mxu0 %v985_v60  ;;  %662 = vmatpush1.bf16.msra.mxu1 %v988_v61 }
  0x7c   :  { %620 = vmatprep.subr.bf16.mxu0 %v993_v62  ;;  %663 = vmatprep.subr.bf16.mxu1 %v996_v63 }
  0x7f   :  { %621 = vmatpush1.bf16.msra.mxu0 %v991_v0  ;;  %664 = vmatpush1.bf16.msra.mxu1 %v994_v1 }
  0x82   :  { %639 = vmatmul.mubr.bf16.vlgmr.msra.gmra.mxu0 %v413_v4  ;;  %682 = vmatmul.mubr.bf16.vlgmr.msra.gmra.mxu1 %v413_v4 }
 0x122   :  { %v335_v5 = vpop.f32.mrf.mxu0  ;;  %v378_v6 = vpop.f32.mrf.mxu1 }
 0x124   :  { %v337_v7 = vpop.f32.mrf.mxu0  ;;  %v380_v8 = vpop.f32.mrf.mxu1 }
 0x126   :  { %v339_v9 = vpop.f32.mrf.mxu0  ;;  %v382_v10 = vpop.f32.mrf.mxu1 }
 0x128   :  { %v341_v11 = vpop.f32.mrf.mxu0  ;;  %v384_v12 = vpop.f32.mrf.mxu1 }
 0x142   :  { %v640_v14 = vpop.f32.mrf.mxu0  ;;  %v683_v15 = vpop.f32.mrf.mxu1 }
 0x143   :  { %v692_v16 = vadd.f32 %v640_v14, %v335_v5  ;;  %v694_v21 = vadd.f32 %v683_v15, %v378_v6 }
 0x144   :  { %v642_v18 = vpop.f32.mrf.mxu0  ;;  %v685_v19 = vpop.f32.mrf.mxu1 }
 0x145   :  { %v700_v20 = vadd.f32 %v692_v16, %v395_v13  ;;  %v693_v22 = vadd.f32 %v642_v18, %v337_v7  ;;  %v702_v32 = vadd.f32 %v694_v21, %v397_v23  ;;  %v695_v43 = vadd.f32 %v685_v19, %v380_v8 }
 0x146   :  { %v644_v24 = vpop.f32.mrf.mxu0  ;;  %v687_v29 = vpop.f32.mrf.mxu1 }
 0x147   :  { %v718_v25 = vmul.f32 0.5, %v700_v20  ;;  %v701_v26 = vadd.f32 %v693_v22, %v396_v17  ;;  %v696_v28 = vadd.f32 %v644_v24, %v339_v9  ;;  %v698_v36 = vadd.f32 %v687_v29, %v382_v10 }
 0x148   :  { %v646_v31 = vpop.f32.mrf.mxu0  ;;  %v689_v41 = vpop.f32.mrf.mxu1  ;;  %v703_v47 = vadd.f32 %v695_v43, %v398_v44 }
 0x149   :  { %997 = vtanh.f32 %v718_v25  ;;  %v708_v33 = vmul.f32 0.5, %v701_v26  ;;  %v697_v34 = vadd.f32 %v646_v31, %v341_v11  ;;  %v704_v35 = vadd.f32 %v696_v28, %v399_v27 }
 0x14a   :  { %v706_v42 = vadd.f32 %v698_v36, %v401_v39  ;;  %v699_v45 = vadd.f32 %v689_v41, %v384_v12  ;;  %v732_v52 = vmul.f32 0.5, %v703_v47 }
 0x14b   :  { %999 = vtanh.f32 %v708_v33  ;;  %v705_v37 = vadd.f32 %v697_v34, %v400_v30  ;;  %v719_v38 = vmul.f32 0.5, %v704_v35 }
 0x14c   :  { %1001 = vtanh.f32 %v702_v32  ;;  %v707_v48 = vadd.f32 %v699_v45, %v402_v46 }
 0x14d   :  { %v709_v40 = vmul.f32 0.5, %v705_v37  ;;  %1003 = vtanh.f32 %v719_v38 }
 0x14e   :  { %v733_v55 = vmul.f32 0.5, %v707_v48 }
 0x14f   :  { %1005 = vtanh.f32 %v709_v40 }
 0x150   :  { %1007 = vtanh.f32 %v706_v42 }
 0x151   :  { %1009 = vtanh.f32 %v732_v52 }
 0x152   :  { %1011 = vtanh.f32 %v733_v55 }
 0x156   :  { %v998_v49 = vpop.eup %997 }
 0x157   :  { %v722_v50 = vadd.f32 1.0, %v998_v49 }
 0x158   :  { %v1000_v51 = vpop.eup %999 }
 0x159   :  { %v724_v53 = vmul.f32 0.5, %v722_v50  ;;  %v712_v54 = vadd.f32 1.0, %v1000_v51  ;;  %v1002_v56 = vpop.eup %1001 }
 0x15a   :  { %v1004_v57 = vpop.eup %1003 }
 0x15b   :  { %v714_v58 = vmul.f32 0.5, %v712_v54  ;;  %v723_v60 = vadd.f32 1.0, %v1004_v57  ;;  %v728_v62 = vmul.f32 %v1002_v56, %v724_v53 }
 0x15c   :  { %v1006_v59 = vpop.eup %1005 }
 0x15d   :  { %v716_v61 = vmul.f32 %v714_v58, %v1240_v2  ;;  %v713_v63 = vadd.f32 1.0, %v1006_v59  ;;  %v725_v0 = vmul.f32 0.5, %v723_v60  ;;  %v1008_v5 = vpop.eup %1007 }
 0x15f   :  { %v730_v1 = vadd.f32 %v728_v62, %v716_v61  ;;  %v715_v4 = vmul.f32 0.5, %v713_v63  ;;  %v729_v7 = vmul.f32 %v1008_v5, %v725_v0 }
 0x161   :  { %v717_v6 = vmul.f32 %v715_v4, %v1242_v3  ;;  %1013 = vtanh.f32 %v730_v1 }
 0x163   :  { %v731_v8 = vadd.f32 %v729_v7, %v717_v6 }
 0x165   :  { %1015 = vtanh.f32 %v731_v8  ;;  %v882_v9 = vpack.c.bf16 %v731_v8, %v730_v1 }
 0x167   :  { %883 = vst [vmem:[#allocation14] sm:$0xff] %v882_v9  }
 0x168   :  { %1128 = shalt.err (!%p1125_p1)
}
 0x169   :  { %789 = dma.vmem_to_hbm [thread:$0]  %s784_s4, 128, %s1266_s6, [#allocation15], %s1168_s24, %s1168_s24, %s1169_s25   ;;  %v1010_v2 = vpop.eup %1009 }
 0x16a   :  { %v1012_v3 = vpop.eup %1011  ;;  %v736_v10 = vadd.f32 1.0, %v1010_v2  ;;  %s1182_s8 = smov [#allocation13]  }
 0x16b   :  { %v737_v11 = vadd.f32 1.0, %v1012_v3  ;;  %s771_s9 = sshll.u32 %s1182_s8, 4  ;;  %s772_s9 = int_to_ptr.vmem [resolvable:$true] %s771_s9 }
 0x16c   :  { %v738_v13 = vmul.f32 0.5, %v736_v10  ;;  %s1137_s10 = scalar_lea.vmem %s772_s9, 128  ;;  %p1142_p3 = scmp.lt.s32.totalorder %s772_s9, %s772_s9 }
 0x16d   :  { %v739_v14 = vmul.f32 0.5, %v737_v11  ;;  %p1138_p2 = scmp.ne.s32.totalorder %s772_s9, %s1137_s10  ;;  %p1143_p4 = scmp.lt.s32.totalorder %s1137_s10, %s1137_s10 }
 0x16e   :  { %v1014_v12 = vpop.eup %1013 }
 0x16f   :  { %v742_v16 = vmul.f32 %v1014_v12, %v738_v13  ;;  %p1144_p5 = por %p1143_p4, %p1142_p3 }
 0x171   :  { %p1145_p6 = pnand %p1144_p5, %p1138_p2 }
 0x172   :  { %v1016_v15 = vpop.eup %1015 }
 0x173   :  { %v743_v17 = vmul.f32 %v1016_v15, %v739_v14 }
 0x175   :  { %v877_v18 = vpack.c.bf16 %v743_v17, %v742_v16 }
 0x177   :  { %878 = vst [vmem:[#allocation13] sm:$0xff] %v877_v18  }
 0x178   :  { %1148 = shalt.err (!%p1145_p6)
}
 0x179   :  { %777 = dma.vmem_to_hbm [thread:$0]  %s772_s9, 128, %s1265_s5, [#allocation6], %s1168_s24, %s1168_s24, %s1169_s25  }
 0x17a   :  { %1163 = dma.done.wait [#allocation6], 128  }
 0x17b   :  { %1164 = vsyncadd [#allocation6], 4294967168 }
 0x17c   :  { %1165 = dma.done.wait [#allocation15], 128  }
 0x17d   :  { %1166 = vsyncadd [#allocation15], 4294967168 }
 0x17e   :  { %796 = vsyncpa [#allocation5], 1 }
 0x17f   :  { %797 = vsyncpa [#allocation8], 1 }
 0x180   :  { %798 = vsyncpa [#allocation11], 1 }
 0x181   :  { %799 = vsyncpa [#allocation6], 1 }
 0x182   :  { %800 = vsyncpa [#allocation15], 1 }

// kernel: tpu_custom_call.1
= control target key start
LH: loop header
LB: loop body
LE: loop exit
PB: predicated region body
PF: predicated region fallthrough
CT: control target
= control target key end

     0   :  { %12 = vsyncpa [#allocation5], 0  ;;  %s1260_s0 = inlined_call_operand.hbm [shape: f32[16,128], index: 0, kind: input, shape index: {}]   ;;  %s1261_s1 = inlined_call_operand.hbm [shape: bf16[1,16,128], index: 1, kind: input, shape index: {}]   ;;  %s1262_s2 = inlined_call_operand.hbm [shape: bf16[128,512], index: 2, kind: input, shape index: {}]   ;;  %s1263_s3 = inlined_call_operand.hbm [shape: bf16[128,512], index: 3, kind: input, shape index: {}]   ;;  %s1264_s4 = inlined_call_operand.hbm [shape: f32[16,512], index: 4, kind: input, shape index: {}]   ;;  %s1265_s5 = inlined_call_operand.hbm [shape: bf16[1,16,128], index: 5, kind: output, shape index: {0}]   ;;  %s1266_s6 = inlined_call_operand.hbm [shape: bf16[1,16,128], index: 6, kind: output, shape index: {1}]  }
   0x1   :  { %13 = vsyncpa [#allocation8], 0 }
   0x2   :  { %14 = vsyncpa [#allocation11], 0 }
   0x3   :  { %15 = vsyncpa [#allocation6], 0 }
   0x4   :  { %16 = vsyncpa [#allocation15], 0  ;;  %s1167_s21 = smov [#allocation7]  }
   0x5   :  { %s34_s22 = sshll.u32 %s1167_s21, 4  ;;  %s35_s22 = int_to_ptr.vmem [resolvable:$true] %s34_s22 }
   0x6   :  { %s1025_s23 = scalar_lea.vmem %s35_s22, 128  ;;  %p1030_p1 = scmp.lt.s32.totalorder %s35_s22, %s35_s22 }
   0x7   :  { %p1026_p0 = scmp.ne.s32.totalorder %s35_s22, %s1025_s23  ;;  %p1031_p2 = scmp.lt.s32.totalorder %s1025_s23, %s1025_s23 }
   0x9   :  { %p1032_p3 = por %p1031_p2, %p1030_p1 }
   0xb   :  { %p1033_p4 = pnand %p1032_p3, %p1026_p0 }
   0xd   :  { %1036 = shalt.err (!%p1033_p4)
}
   0xe   :  { %s1168_s24 = smov 64   ;;  %s1169_s25 = smov 4  }
   0xf   :  { %40 = dma.hbm_to_vmem [thread:$0]  %s1261_s1, 128, %s35_s22, [#allocation8], %s1168_s24, %s1168_s24, %s1169_s25  }
  0x10   :  { %s1170_s28 = smov [#allocation10]   ;;  %s1171_s30 = smov [#allocation4]  }
  0x11   :  { %s58_s29 = sshll.u32 %s1170_s28, 4  ;;  %s22_s7 = sshll.u32 %s1171_s30, 4  ;;  %s59_s29 = int_to_ptr.vmem [resolvable:$true] %s58_s29  ;;  %s23_s7 = int_to_ptr.vmem [resolvable:$true] %s22_s7 }
  0x12   :  { %s1045_s8 = scalar_lea.vmem %s59_s29, 4096  ;;  %p1050_p6 = scmp.lt.s32.totalorder %s59_s29, %s59_s29 }
  0x13   :  { %p1046_p5 = scmp.ne.s32.totalorder %s59_s29, %s1045_s8  ;;  %p1051_p7 = scmp.lt.s32.totalorder %s1045_s8, %s1045_s8 }
  0x15   :  { %p1052_p8 = por %p1051_p7, %p1050_p6 }
  0x17   :  { %p1053_p9 = pnand %p1052_p8, %p1046_p5 }
  0x19   :  { %1056 = shalt.err (!%p1053_p9)
}
  0x1a   :  { %s1172_s9 = smov 256   ;;  %s1173_s10 = smov 16  }
  0x1b   :  { %64 = dma.hbm_to_vmem [thread:$0]  %s1263_s3, 4096, %s59_s29, [#allocation11], %s1172_s9, %s1172_s9, %s1173_s10  }
  0x1c   :  { %s1065_s1 = scalar_lea.vmem %s23_s7, 256  ;;  %p1070_p11 = scmp.lt.s32.totalorder %s23_s7, %s23_s7 }
  0x1d   :  { %p1066_p10 = scmp.ne.s32.totalorder %s23_s7, %s1065_s1  ;;  %p1071_p12 = scmp.lt.s32.totalorder %s1065_s1, %s1065_s1 }
  0x1f   :  { %p1072_p13 = por %p1071_p12, %p1070_p11 }
  0x21   :  { %p1073_p0 = pnand %p1072_p13, %p1066_p10 }
  0x23   :  { %1076 = shalt.err (!%p1073_p0)
}
  0x24   :  { %s1174_s13 = smov 128   ;;  %s1175_s14 = smov 8  }
  0x25   :  { %28 = dma.hbm_to_vmem [thread:$0]  %s1260_s0, 256, %s23_s7, [#allocation5], %s1174_s13, %s1174_s13, %s1175_s14  }
  0x26   :  { %s1176_s17 = smov [#allocation9]   ;;  %s1177_s19 = smov [#allocation12]  }
  0x27   :  { %s46_s18 = sshll.u32 %s1176_s17, 4  ;;  %s70_s20 = sshll.u32 %s1177_s19, 4  ;;  %s47_s18 = int_to_ptr.vmem [resolvable:$true] %s46_s18  ;;  %s71_s20 = int_to_ptr.vmem [resolvable:$true] %s70_s20 }
  0x28   :  { %s1085_s3 = scalar_lea.vmem %s47_s18, 4096  ;;  %p1090_p2 = scmp.lt.s32.totalorder %s47_s18, %s47_s18 }
  0x29   :  { %p1086_p1 = scmp.ne.s32.totalorder %s47_s18, %s1085_s3  ;;  %p1091_p3 = scmp.lt.s32.totalorder %s1085_s3, %s1085_s3 }
  0x2b   :  { %p1092_p4 = por %p1091_p3, %p1090_p2 }
  0x2d   :  { %p1093_p5 = pnand %p1092_p4, %p1086_p1 }
  0x2f   :  { %1096 = shalt.err (!%p1093_p5)
}
  0x30   :  { %52 = dma.hbm_to_vmem [thread:$0]  %s1262_s2, 4096, %s47_s18, [#allocation8], %s1172_s9, %s1172_s9, %s1173_s10  }
  0x31   :  { %s1105_s23 = scalar_lea.vmem %s71_s20, 1024  ;;  %p1110_p7 = scmp.lt.s32.totalorder %s71_s20, %s71_s20 }
  0x32   :  { %p1106_p6 = scmp.ne.s32.totalorder %s71_s20, %s1105_s23  ;;  %p1111_p8 = scmp.lt.s32.totalorder %s1105_s23, %s1105_s23 }
  0x34   :  { %p1112_p9 = por %p1111_p8, %p1110_p7 }
  0x36   :  { %p1113_p10 = pnand %p1112_p9, %p1106_p6 }
  0x38   :  { %1116 = shalt.err (!%p1113_p10)
}
  0x39   :  { %s1178_s0 = smov 512   ;;  %s1179_s26 = smov 32  }
  0x3a   :  { %76 = dma.hbm_to_vmem [thread:$0]  %s1264_s4, 1024, %s71_s20, [#allocation11], %s1178_s0, %s1178_s0, %s1179_s26  }
  0x3b   :  { %1157 = dma.done.wait [#allocation5], 256  }
  0x3c   :  { %1158 = vsyncadd [#allocation5], 4294967040 }
  0x3d   :  { %1159 = dma.done.wait [#allocation8], 4224  }
  0x3e   :  { %1160 = vsyncadd [#allocation8], 4294963072 }
  0x3f   :  { %1161 = dma.done.wait [#allocation11], 5120  }
  0x40   :  { %1162 = vsyncadd [#allocation11], 4294962176  ;;  %v1180_v0 = vmov 0   ;;  %v900_v1 = vld [vmem:[#allocation9 + $0xe4] ss:$16 sps:$4 sm:$0xff]   ;;  %v948_v35 = vld [vmem:[#allocation7] sm:$0xff]  }
  0x41   :  { %333 = vmatprep.mubr.bf16.mxu0 %v1180_v0  ;;  %376 = vmatprep.mubr.bf16.mxu1 %v1180_v0  ;;  %v902_v2 = vld [vmem:[#allocation9 + $0xec] ss:$16 sps:$4 sm:$0xff]   ;;  %v904_v3 = vld [vmem:[#allocation9 + $0xe0] ss:$16 sps:$4 sm:$0xff]   ;;  %v905_v4 = vld [vmem:[#allocation9 + $0xe8] ss:$16 sps:$4 sm:$0xff]  }
  0x42   :  { %301 = vmatprep.subr.bf16.mxu0 %v900_v1  ;;  %344 = vmatprep.subr.bf16.mxu1 %v902_v2  ;;  %v906_v5 = vld [vmem:[#allocation9 + $0xc4] ss:$16 sps:$4 sm:$0xff]   ;;  %v908_v6 = vld [vmem:[#allocation9 + $0xcc] ss:$16 sps:$4 sm:$0xff]   ;;  %v910_v7 = vld [vmem:[#allocation9 + $0xc0] ss:$16 sps:$4 sm:$0xff]  }
  0x43   :  { %302 = vmatpush1.bf16.msra.mxu0 %v904_v3  ;;  %345 = vmatpush1.bf16.msra.mxu1 %v905_v4  ;;  %v911_v8 = vld [vmem:[#allocation9 + $0xc8] ss:$16 sps:$4 sm:$0xff]   ;;  %v912_v9 = vld [vmem:[#allocation9 + $0xa4] ss:$16 sps:$4 sm:$0xff]   ;;  %v914_v10 = vld [vmem:[#allocation9 + $0xac] ss:$16 sps:$4 sm:$0xff]  }
  0x44   :  { %303 = vmatprep.subr.bf16.mxu0 %v906_v5  ;;  %346 = vmatprep.subr.bf16.mxu1 %v908_v6  ;;  %v916_v11 = vld [vmem:[#allocation9 + $0xa0] ss:$16 sps:$4 sm:$0xff]   ;;  %v917_v12 = vld [vmem:[#allocation9 + $0xa8] ss:$16 sps:$4 sm:$0xff]   ;;  %v918_v13 = vld [vmem:[#allocation9 + $0x84] ss:$16 sps:$4 sm:$0xff]  }
  0x45   :  { %v920_v14 = vld [vmem:[#allocation9 + $0x8c] ss:$16 sps:$4 sm:$0xff]   ;;  %v922_v15 = vld [vmem:[#allocation9 + $0x80] ss:$16 sps:$4 sm:$0xff]   ;;  %v923_v16 = vld [vmem:[#allocation9 + $0x88] ss:$16 sps:$4 sm:$0xff]  }
  0x46   :  { %v924_v17 = vld [vmem:[#allocation9 + $0x64] ss:$16 sps:$4 sm:$0xff]   ;;  %v926_v18 = vld [vmem:[#allocation9 + $0x6c] ss:$16 sps:$4 sm:$0xff]   ;;  %v928_v19 = vld [vmem:[#allocation9 + $0x60] ss:$16 sps:$4 sm:$0xff]  }
  0x47   :  { %304 = vmatpush1.bf16.msra.mxu0 %v910_v7  ;;  %347 = vmatpush1.bf16.msra.mxu1 %v911_v8  ;;  %v929_v20 = vld [vmem:[#allocation9 + $0x68] ss:$16 sps:$4 sm:$0xff]   ;;  %v930_v21 = vld [vmem:[#allocation9 + $0x44] ss:$16 sps:$4 sm:$0xff]   ;;  %v932_v22 = vld [vmem:[#allocation9 + $0x4c] ss:$16 sps:$4 sm:$0xff]  }
  0x48   :  { %305 = vmatprep.subr.bf16.mxu0 %v912_v9  ;;  %348 = vmatprep.subr.bf16.mxu1 %v914_v10  ;;  %v934_v23 = vld [vmem:[#allocation9 + $0x40] ss:$16 sps:$4 sm:$0xff]   ;;  %v935_v24 = vld [vmem:[#allocation9 + $0x48] ss:$16 sps:$4 sm:$0xff]   ;;  %v936_v25 = vld [vmem:[#allocation9 + $0x24] ss:$16 sps:$4 sm:$0xff]  }
  0x49   :  { %v938_v26 = vld [vmem:[#allocation9 + $0x2c] ss:$16 sps:$4 sm:$0xff]   ;;  %v940_v27 = vld [vmem:[#allocation9 + $0x20] ss:$16 sps:$4 sm:$0xff]   ;;  %v941_v28 = vld [vmem:[#allocation9 + $0x28] ss:$16 sps:$4 sm:$0xff]  }
  0x4a   :  { %v942_v29 = vld [vmem:[#allocation9 + $0x4] ss:$16 sps:$4 sm:$0xff]   ;;  %v944_v30 = vld [vmem:[#allocation9 + $0xc] ss:$16 sps:$4 sm:$0xff]   ;;  %v946_v31 = vld [vmem:[#allocation9] ss:$16 sps:$4 sm:$0xff]  }
  0x4b   :  { %306 = vmatpush1.bf16.msra.mxu0 %v916_v11  ;;  %349 = vmatpush1.bf16.msra.mxu1 %v917_v12  ;;  %v947_v32 = vld [vmem:[#allocation9 + $0x8] ss:$16 sps:$4 sm:$0xff]   ;;  %v951_v33 = vld [vmem:[#allocation10 + $0xe4] ss:$16 sps:$4 sm:$0xff]   ;;  %v954_v34 = vld [vmem:[#allocation10 + $0xec] ss:$16 sps:$4 sm:$0xff]  }
  0x4c   :  { %307 = vmatprep.subr.bf16.mxu0 %v918_v13  ;;  %350 = vmatprep.subr.bf16.mxu1 %v920_v14  ;;  %v949_v36 = vld [vmem:[#allocation10 + $0xe0] ss:$16 sps:$4 sm:$0xff]   ;;  %v952_v37 = vld [vmem:[#allocation10 + $0xe8] ss:$16 sps:$4 sm:$0xff]   ;;  %v957_v38 = vld [vmem:[#allocation10 + $0xc4] ss:$16 sps:$4 sm:$0xff]  }
  0x4d   :  { %v960_v39 = vld [vmem:[#allocation10 + $0xcc] ss:$16 sps:$4 sm:$0xff]   ;;  %v955_v40 = vld [vmem:[#allocation10 + $0xc0] ss:$16 sps:$4 sm:$0xff]   ;;  %v958_v41 = vld [vmem:[#allocation10 + $0xc8] ss:$16 sps:$4 sm:$0xff]  }
  0x4e   :  { %v963_v42 = vld [vmem:[#allocation10 + $0xa4] ss:$16 sps:$4 sm:$0xff]   ;;  %v966_v43 = vld [vmem:[#allocation10 + $0xac] ss:$16 sps:$4 sm:$0xff]   ;;  %v961_v44 = vld [vmem:[#allocation10 + $0xa0] ss:$16 sps:$4 sm:$0xff]  }
  0x4f   :  { %308 = vmatpush1.bf16.msra.mxu0 %v922_v15  ;;  %351 = vmatpush1.bf16.msra.mxu1 %v923_v16  ;;  %v964_v45 = vld [vmem:[#allocation10 + $0xa8] ss:$16 sps:$4 sm:$0xff]   ;;  %v969_v46 = vld [vmem:[#allocation10 + $0x84] ss:$16 sps:$4 sm:$0xff]   ;;  %v972_v47 = vld [vmem:[#allocation10 + $0x8c] ss:$16 sps:$4 sm:$0xff]  }
  0x50   :  { %309 = vmatprep.subr.bf16.mxu0 %v924_v17  ;;  %352 = vmatprep.subr.bf16.mxu1 %v926_v18  ;;  %v967_v48 = vld [vmem:[#allocation10 + $0x80] ss:$16 sps:$4 sm:$0xff]   ;;  %v970_v49 = vld [vmem:[#allocation10 + $0x88] ss:$16 sps:$4 sm:$0xff]   ;;  %v975_v50 = vld [vmem:[#allocation10 + $0x64] ss:$16 sps:$4 sm:$0xff]  }
  0x51   :  { %v978_v51 = vld [vmem:[#allocation10 + $0x6c] ss:$16 sps:$4 sm:$0xff]   ;;  %v973_v52 = vld [vmem:[#allocation10 + $0x60] ss:$16 sps:$4 sm:$0xff]   ;;  %v976_v53 = vld [vmem:[#allocation10 + $0x68] ss:$16 sps:$4 sm:$0xff]  }
  0x52   :  { %v981_v54 = vld [vmem:[#allocation10 + $0x44] ss:$16 sps:$4 sm:$0xff]   ;;  %v984_v55 = vld [vmem:[#allocation10 + $0x4c] ss:$16 sps:$4 sm:$0xff]   ;;  %v979_v56 = vld [vmem:[#allocation10 + $0x40] ss:$16 sps:$4 sm:$0xff]  }
  0x53   :  { %310 = vmatpush1.bf16.msra.mxu0 %v928_v19  ;;  %353 = vmatpush1.bf16.msra.mxu1 %v929_v20  ;;  %v982_v57 = vld [vmem:[#allocation10 + $0x48] ss:$16 sps:$4 sm:$0xff]   ;;  %v987_v58 = vld [vmem:[#allocation10 + $0x24] ss:$16 sps:$4 sm:$0xff]   ;;  %v990_v59 = vld [vmem:[#allocation10 + $0x2c] ss:$16 sps:$4 sm:$0xff]  }
  0x54   :  { %311 = vmatprep.subr.bf16.mxu0 %v930_v21  ;;  %354 = vmatprep.subr.bf16.mxu1 %v932_v22  ;;  %v985_v60 = vld [vmem:[#allocation10 + $0x20] ss:$16 sps:$4 sm:$0xff]   ;;  %v988_v61 = vld [vmem:[#allocation10 + $0x28] ss:$16 sps:$4 sm:$0xff]   ;;  %v993_v62 = vld [vmem:[#allocation10 + $0x4] ss:$16 sps:$4 sm:$0xff]  }
  0x55   :  { %v996_v63 = vld [vmem:[#allocation10 + $0xc] ss:$16 sps:$4 sm:$0xff]   ;;  %v994_v1 = vld [vmem:[#allocation10 + $0x8] ss:$16 sps:$4 sm:$0xff]   ;;  %v1242_v3 = vld [vmem:[#allocation4 + $0x8] sm:$0xff]  ;;  %s1181_s2 = smov [#allocation14]  }
  0x56   :  { %v1240_v2 = vld [vmem:[#allocation4] sm:$0xff]  ;;  %v395_v13 = vld [vmem:[#allocation12] sm:$0xff]  ;;  %s783_s4 = sshll.u32 %s1181_s2, 4  ;;  %s784_s4 = int_to_ptr.vmem [resolvable:$true] %s783_s4 }
  0x57   :  { %312 = vmatpush1.bf16.msra.mxu0 %v934_v23  ;;  %355 = vmatpush1.bf16.msra.mxu1 %v935_v24  ;;  %v413_v4 = vpack.c.bf16 %v1242_v3, %v1240_v2  ;;  %v396_v17 = vld [vmem:[#allocation12 + $0x8] sm:$0xff]  ;;  %v397_v23 = vld [vmem:[#allocation12 + $0x10] sm:$0xff]  ;;  %s1117_s29 = scalar_lea.vmem %s784_s4, 128  ;;  %p1122_p12 = scmp.lt.s32.totalorder %s784_s4, %s784_s4 }
  0x58   :  { %313 = vmatprep.subr.bf16.mxu0 %v936_v25  ;;  %356 = vmatprep.subr.bf16.mxu1 %v938_v26  ;;  %p1118_p11 = scmp.ne.s32.totalorder %s784_s4, %s1117_s29  ;;  %p1123_p13 = scmp.lt.s32.totalorder %s1117_s29, %s1117_s29 }
  0x5a   :  { %p1124_p0 = por %p1123_p13, %p1122_p12 }
  0x5b   :  { %314 = vmatpush1.bf16.msra.mxu0 %v940_v27  ;;  %357 = vmatpush1.bf16.msra.mxu1 %v941_v28  ;;  %v399_v27 = vld [vmem:[#allocation12 + $0x20] sm:$0xff] }
  0x5c   :  { %315 = vmatprep.subr.bf16.mxu0 %v942_v29  ;;  %358 = vmatprep.subr.bf16.mxu1 %v944_v30  ;;  %v400_v30 = vld [vmem:[#allocation12 + $0x28] sm:$0xff]  ;;  %p1125_p1 = pnand %p1124_p0, %p1118_p11 }
  0x5f   :  { %316 = vmatpush1.bf16.msra.mxu0 %v946_v31  ;;  %359 = vmatpush1.bf16.msra.mxu1 %v947_v32 }
  0x60   :  { %606 = vmatprep.subr.bf16.mxu0 %v951_v33  ;;  %649 = vmatprep.subr.bf16.mxu1 %v954_v34 }
  0x62   :  { %334 = vmatmul.mubr.bf16.vlgmr.msra.gmra.mxu0 %v948_v35  ;;  %377 = vmatmul.mubr.bf16.vlgmr.msra.gmra.mxu1 %v948_v35 }
  0x63   :  { %607 = vmatpush1.bf16.msra.mxu0 %v949_v36  ;;  %650 = vmatpush1.bf16.msra.mxu1 %v952_v37 }
  0x64   :  { %608 = vmatprep.subr.bf16.mxu0 %v957_v38  ;;  %651 = vmatprep.subr.bf16.mxu1 %v960_v39  ;;  %v401_v39 = vld [vmem:[#allocation12 + $0x30] sm:$0xff] }
  0x65   :  { %638 = vmatprep.mubr.bf16.mxu0 %v1180_v0  ;;  %681 = vmatprep.mubr.bf16.mxu1 %v1180_v0  ;;  %v991_v0 = vld [vmem:[#allocation10] ss:$16 sps:$4 sm:$0xff]  }
  0x67   :  { %609 = vmatpush1.bf16.msra.mxu0 %v955_v40  ;;  %652 = vmatpush1.bf16.msra.mxu1 %v958_v41 }
  0x68   :  { %610 = vmatprep.subr.bf16.mxu0 %v963_v42  ;;  %653 = vmatprep.subr.bf16.mxu1 %v966_v43 }
  0x6b   :  { %611 = vmatpush1.bf16.msra.mxu0 %v961_v44  ;;  %654 = vmatpush1.bf16.msra.mxu1 %v964_v45  ;;  %v398_v44 = vld [vmem:[#allocation12 + $0x18] sm:$0xff] }
  0x6c   :  { %612 = vmatprep.subr.bf16.mxu0 %v969_v46  ;;  %655 = vmatprep.subr.bf16.mxu1 %v972_v47  ;;  %v402_v46 = vld [vmem:[#allocation12 + $0x38] sm:$0xff] }
  0x6f   :  { %613 = vmatpush1.bf16.msra.mxu0 %v967_v48  ;;  %656 = vmatpush1.bf16.msra.mxu1 %v970_v49 }
  0x70   :  { %614 = vmatprep.subr.bf16.mxu0 %v975_v50  ;;  %657 = vmatprep.subr.bf16.mxu1 %v978_v51 }
  0x73   :  { %615 = vmatpush1.bf16.msra.mxu0 %v973_v52  ;;  %658 = vmatpush1.bf16.msra.mxu1 %v976_v53 }
  0x74   :  { %616 = vmatprep.subr.bf16.mxu0 %v981_v54  ;;  %659 = vmatprep.subr.bf16.mxu1 %v984_v55 }
  0x77   :  { %617 = vmatpush1.bf16.msra.mxu0 %v979_v56  ;;  %660 = vmatpush1.bf16.msra.mxu1 %v982_v57 }
  0x78   :  { %618 = vmatprep.subr.bf16.mxu0 %v987_v58  ;;  %661 = vmatprep.subr.bf16.mxu1 %v990_v59 }
  0x7b   :  { %619 = vmatpush1.bf16.msra.mxu0 %v985_v60  ;;  %662 = vmatpush1.bf16.msra.mxu1 %v988_v61 }
  0x7c   :  { %620 = vmatprep.subr.bf16.mxu0 %v993_v62  ;;  %663 = vmatprep.subr.bf16.mxu1 %v996_v63 }
  0x7f   :  { %621 = vmatpush1.bf16.msra.mxu0 %v991_v0  ;;  %664 = vmatpush1.bf16.msra.mxu1 %v994_v1 }
  0x82   :  { %639 = vmatmul.mubr.bf16.vlgmr.msra.gmra.mxu0 %v413_v4  ;;  %682 = vmatmul.mubr.bf16.vlgmr.msra.gmra.mxu1 %v413_v4 }
 0x122   :  { %v335_v5 = vpop.f32.mrf.mxu0  ;;  %v378_v6 = vpop.f32.mrf.mxu1 }
 0x124   :  { %v337_v7 = vpop.f32.mrf.mxu0  ;;  %v380_v8 = vpop.f32.mrf.mxu1 }
 0x126   :  { %v339_v9 = vpop.f32.mrf.mxu0  ;;  %v382_v10 = vpop.f32.mrf.mxu1 }
 0x128   :  { %v341_v11 = vpop.f32.mrf.mxu0  ;;  %v384_v12 = vpop.f32.mrf.mxu1 }
 0x142   :  { %v640_v14 = vpop.f32.mrf.mxu0  ;;  %v683_v15 = vpop.f32.mrf.mxu1 }
 0x143   :  { %v692_v16 = vadd.f32 %v640_v14, %v335_v5  ;;  %v694_v21 = vadd.f32 %v683_v15, %v378_v6 }
 0x144   :  { %v642_v18 = vpop.f32.mrf.mxu0  ;;  %v685_v19 = vpop.f32.mrf.mxu1 }
 0x145   :  { %v700_v20 = vadd.f32 %v692_v16, %v395_v13  ;;  %v693_v22 = vadd.f32 %v642_v18, %v337_v7  ;;  %v702_v32 = vadd.f32 %v694_v21, %v397_v23  ;;  %v695_v43 = vadd.f32 %v685_v19, %v380_v8 }
 0x146   :  { %v644_v24 = vpop.f32.mrf.mxu0  ;;  %v687_v29 = vpop.f32.mrf.mxu1 }
 0x147   :  { %v718_v25 = vmul.f32 0.5, %v700_v20  ;;  %v701_v26 = vadd.f32 %v693_v22, %v396_v17  ;;  %v696_v28 = vadd.f32 %v644_v24, %v339_v9  ;;  %v698_v36 = vadd.f32 %v687_v29, %v382_v10 }
 0x148   :  { %v646_v31 = vpop.f32.mrf.mxu0  ;;  %v689_v41 = vpop.f32.mrf.mxu1  ;;  %v703_v47 = vadd.f32 %v695_v43, %v398_v44 }
 0x149   :  { %997 = vtanh.f32 %v718_v25  ;;  %v708_v33 = vmul.f32 0.5, %v701_v26  ;;  %v697_v34 = vadd.f32 %v646_v31, %v341_v11  ;;  %v704_v35 = vadd.f32 %v696_v28, %v399_v27 }
 0x14a   :  { %v706_v42 = vadd.f32 %v698_v36, %v401_v39  ;;  %v699_v45 = vadd.f32 %v689_v41, %v384_v12  ;;  %v732_v52 = vmul.f32 0.5, %v703_v47 }
 0x14b   :  { %999 = vtanh.f32 %v708_v33  ;;  %v705_v37 = vadd.f32 %v697_v34, %v400_v30  ;;  %v719_v38 = vmul.f32 0.5, %v704_v35 }
 0x14c   :  { %1001 = vtanh.f32 %v702_v32  ;;  %v707_v48 = vadd.f32 %v699_v45, %v402_v46 }
 0x14d   :  { %v709_v40 = vmul.f32 0.5, %v705_v37  ;;  %1003 = vtanh.f32 %v719_v38 }
 0x14e   :  { %v733_v55 = vmul.f32 0.5, %v707_v48 }
 0x14f   :  { %1005 = vtanh.f32 %v709_v40 }
 0x150   :  { %1007 = vtanh.f32 %v706_v42 }
 0x151   :  { %1009 = vtanh.f32 %v732_v52 }
 0x152   :  { %1011 = vtanh.f32 %v733_v55 }
 0x156   :  { %v998_v49 = vpop.eup %997 }
 0x157   :  { %v722_v50 = vadd.f32 1.0, %v998_v49 }
 0x158   :  { %v1000_v51 = vpop.eup %999 }
 0x159   :  { %v724_v53 = vmul.f32 0.5, %v722_v50  ;;  %v712_v54 = vadd.f32 1.0, %v1000_v51  ;;  %v1002_v56 = vpop.eup %1001 }
 0x15a   :  { %v1004_v57 = vpop.eup %1003 }
 0x15b   :  { %v714_v58 = vmul.f32 0.5, %v712_v54  ;;  %v723_v60 = vadd.f32 1.0, %v1004_v57  ;;  %v728_v62 = vmul.f32 %v1002_v56, %v724_v53 }
 0x15c   :  { %v1006_v59 = vpop.eup %1005 }
 0x15d   :  { %v716_v61 = vmul.f32 %v714_v58, %v1240_v2  ;;  %v713_v63 = vadd.f32 1.0, %v1006_v59  ;;  %v725_v0 = vmul.f32 0.5, %v723_v60  ;;  %v1008_v5 = vpop.eup %1007 }
 0x15f   :  { %v730_v1 = vadd.f32 %v728_v62, %v716_v61  ;;  %v715_v4 = vmul.f32 0.5, %v713_v63  ;;  %v729_v7 = vmul.f32 %v1008_v5, %v725_v0 }
 0x161   :  { %v717_v6 = vmul.f32 %v715_v4, %v1242_v3  ;;  %1013 = vtanh.f32 %v730_v1 }
 0x163   :  { %v731_v8 = vadd.f32 %v729_v7, %v717_v6 }
 0x165   :  { %1015 = vtanh.f32 %v731_v8  ;;  %v882_v9 = vpack.c.bf16 %v731_v8, %v730_v1 }
 0x167   :  { %883 = vst [vmem:[#allocation14] sm:$0xff] %v882_v9  }
 0x168   :  { %1128 = shalt.err (!%p1125_p1)
}
 0x169   :  { %789 = dma.vmem_to_hbm [thread:$0]  %s784_s4, 128, %s1266_s6, [#allocation15], %s1168_s24, %s1168_s24, %s1169_s25   ;;  %v1010_v2 = vpop.eup %1009 }
 0x16a   :  { %v1012_v3 = vpop.eup %1011  ;;  %v736_v10 = vadd.f32 1.0, %v1010_v2  ;;  %s1182_s8 = smov [#allocation13]  }
 0x16b   :  { %v737_v11 = vadd.f32 1.0, %v1012_v3  ;;  %s771_s9 = sshll.u32 %s1182_s8, 4  ;;  %s772_s9 = int_to_ptr.vmem [resolvable:$true] %s771_s9 }
 0x16c   :  { %v738_v13 = vmul.f32 0.5, %v736_v10  ;;  %s1137_s10 = scalar_lea.vmem %s772_s9, 128  ;;  %p1142_p3 = scmp.lt.s32.totalorder %s772_s9, %s772_s9 }
 0x16d   :  { %v739_v14 = vmul.f32 0.5, %v737_v11  ;;  %p1138_p2 = scmp.ne.s32.totalorder %s772_s9, %s1137_s10  ;;  %p1143_p4 = scmp.lt.s32.totalorder %s1137_s10, %s1137_s10 }
 0x16e   :  { %v1014_v12 = vpop.eup %1013 }
 0x16f   :  { %v742_v16 = vmul.f32 %v1014_v12, %v738_v13  ;;  %p1144_p5 = por %p1143_p4, %p1142_p3 }
 0x171   :  { %p1145_p6 = pnand %p1144_p5, %p1138_p2 }
 0x172   :  { %v1016_v15 = vpop.eup %1015 }
 0x173   :  { %v743_v17 = vmul.f32 %v1016_v15, %v739_v14 }
 0x175   :  { %v877_v18 = vpack.c.bf16 %v743_v17, %v742_v16 }
 0x177   :  { %878 = vst [vmem:[#allocation13] sm:$0xff] %v877_v18  }
 0x178   :  { %1148 = shalt.err (!%p1145_p6)
}
 0x179   :  { %777 = dma.vmem_to_hbm [thread:$0]  %s772_s9, 128, %s1265_s5, [#allocation6], %s1168_s24, %s1168_s24, %s1169_s25  }
 0x17a   :  { %1163 = dma.done.wait [#allocation6], 128  }
 0x17b   :  { %1164 = vsyncadd [#allocation6], 4294967168 }
 0x17c   :  { %1165 = dma.done.wait [#allocation15], 128  }
 0x17d   :  { %1166 = vsyncadd [#allocation15], 4294967168 }
 0x17e   :  { %796 = vsyncpa [#allocation5], 1 }
 0x17f   :  { %797 = vsyncpa [#allocation8], 1 }
 0x180   :  { %798 = vsyncpa [#allocation11], 1 }
 0x181   :  { %799 = vsyncpa [#allocation6], 1 }
 0x182   :  { %800 = vsyncpa [#allocation15], 1 }

</bundles_post_ra>
